<compile_context>
chip_gen: v5e
topology: v5e:2x2
jax: 0.10.0
libtpu: 0.0.40
codegen_flags: <defaults>
</compile_context>

<pallas_src>
import jax
import jax.numpy as jnp
from jax.experimental import pallas as pl
from jax.experimental.pallas import tpu as pltpu

# ----------------------------- model config ---------------------------------
VOCAB = 64
HIDDEN = 32
NUM_HEADS = 4
HEAD_DIM = HIDDEN // NUM_HEADS
INTERMEDIATE = 64
NUM_LAYERS = 2
MAX_POS = 16
TYPE_VOCAB = 2
LN_EPS = 1e-12

BATCH = 2
SEQ = 8


# ------------------------------ in-kernel math -------------------------------
def _layer_norm(x, g, b):
    mu = jnp.mean(x, axis=-1, keepdims=True)
    var = jnp.mean((x - mu) ** 2, axis=-1, keepdims=True)
    return (x - mu) * jax.lax.rsqrt(var + LN_EPS) * g + b


def _gelu(x):
    # tanh-approximation GELU (EUP-friendly).
    c = 0.7978845608028654  # sqrt(2/pi)
    return 0.5 * x * (1.0 + jnp.tanh(c * (x + 0.044715 * x * x * x)))


# ------------------------------ fused encoder kernel -------------------------
def encoder_kernel(emb_ref, bias_ref, emb_g_ref, emb_b_ref,
                   wqkv_ref, wo_ref, w1_ref, w2_ref, smallp_ref, out_ref):
    """Single invocation: embedding LayerNorm + all transformer layers, whole batch."""
    BS = BATCH * SEQ

    # Embedding LayerNorm (f32), whole batch as (B*S, H).
    x = _layer_norm(emb_ref[...], emb_g_ref[...], emb_b_ref[...])      # (BS, H)

    # Additive key-axis mask bias, already expanded to (B*NH, 1, S) in wrapper.
    bias = bias_ref[...]                                                # (NH*B,1,S)

    for l in range(NUM_LAYERS):   # static unroll; all layer weights VMEM-resident
        # ---- packed small f32 params for this layer: one (8,128) slab --------
        sp = smallp_ref[l]                                              # (8, 128)
        bqkv = sp[0:1, 0:3 * HIDDEN]        # (1, 96)  (q bias pre-scaled)
        bo   = sp[1:2, 0:HIDDEN]
        ln1g = sp[2:3, 0:HIDDEN]
        ln1b = sp[3:4, 0:HIDDEN]
        b1   = sp[4:5, 0:INTERMEDIATE]
        b2   = sp[5:6, 0:HIDDEN]
        ln2g = sp[6:7, 0:HIDDEN]
        ln2b = sp[7:8, 0:HIDDEN]

        # ---- single lane-dense QKV projection: (BS,H) @ (H,3H) ----------------
        qkv = jnp.dot(x.astype(jnp.bfloat16), wqkv_ref[l],
                      preferred_element_type=jnp.float32) + bqkv        # (BS, 3H)

        # ---- per-(batch,head) views: (NH*B, S, DH) via lane slices + stack ----
        def heads(base):
            t = jnp.stack(
                [qkv[:, base + h * HEAD_DIM: base + (h + 1) * HEAD_DIM]
                 for h in range(NUM_HEADS)], axis=0)                    # (NH, BS, DH)
            t = t.reshape(NUM_HEADS, BATCH, SEQ, HEAD_DIM)
            return t.reshape(NUM_HEADS * BATCH, SEQ, HEAD_DIM)

        q = heads(0)                 # already scaled by 1/sqrt(DH) via packed wq
        k = heads(HIDDEN)
        v = heads(2 * HIDDEN)

        # ---- attention batched over all (B*NH) pairs in one einsum pair -------
        s = jnp.einsum('nqd,nkd->nqk', q.astype(jnp.bfloat16),
                       k.astype(jnp.bfloat16),
                       preferred_element_type=jnp.float32)              # (NH*B,S,S)
        s = s + bias
        s = s - jnp.max(s, axis=-1, keepdims=True)
        p = jnp.exp(s)
        p = p * pl.reciprocal(jnp.sum(p, axis=-1, keepdims=True), approx=True)
        ctx = jnp.einsum('nqk,nkd->nqd', p.astype(jnp.bfloat16),
                         v.astype(jnp.bfloat16),
                         preferred_element_type=jnp.float32)            # (NH*B,S,DH)

        # ---- re-pack heads into (BS, H) and project --------------------------
        ctx = ctx.reshape(NUM_HEADS, BATCH, SEQ, HEAD_DIM)
        ctx = ctx.reshape(NUM_HEADS, BATCH * SEQ, HEAD_DIM)
        ctx_full = jnp.concatenate([ctx[h] for h in range(NUM_HEADS)],
                                   axis=-1)                             # (BS, H)
        attn = jnp.dot(ctx_full.astype(jnp.bfloat16), wo_ref[l],
                       preferred_element_type=jnp.float32) + bo         # (BS, H)
        x1 = _layer_norm(x + attn, ln1g, ln1b)

        # ---- feed-forward ------------------------------------------------------
        hid = _gelu(jnp.dot(x1.astype(jnp.bfloat16), w1_ref[l],
                            preferred_element_type=jnp.float32) + b1)   # (BS, I)
        ffn = jnp.dot(hid.astype(jnp.bfloat16), w2_ref[l],
                      preferred_element_type=jnp.float32) + b2          # (BS, H)
        x = _layer_norm(x1 + ffn, ln2g, ln2b)

    out_ref[...] = x


# ------------------------------ wrapper ---------------------------------------
def bert_encoder(emb2d, bias, emb_ln_g, emb_ln_b, stacked):
    vmem = pl.BlockSpec(memory_space=pltpu.MemorySpace.VMEM)
    return pl.pallas_call(
        encoder_kernel,
        out_shape=jax.ShapeDtypeStruct((emb2d.shape[0], HIDDEN), jnp.float32),
        in_specs=[vmem] * 9,
        out_specs=vmem,
    )(emb2d, bias, emb_ln_g, emb_ln_b,
      stacked["wqkv"], stacked["wo"], stacked["w1"], stacked["w2"],
      stacked["smallp"])


# ------------------------------ parameters ------------------------------------
def init_params(key):
    ks = jax.random.split(key, 3 + NUM_LAYERS)
    std = 0.02
    params = {
        "word_emb": std * jax.random.normal(ks[0], (VOCAB, HIDDEN), jnp.float32),
        "pos_emb":  std * jax.random.normal(ks[1], (MAX_POS, HIDDEN), jnp.float32),
        "type_emb": std * jax.random.normal(ks[2], (TYPE_VOCAB, HIDDEN), jnp.float32),
        "emb_ln_g": jnp.ones((1, HIDDEN), jnp.float32),
        "emb_ln_b": jnp.zeros((1, HIDDEN), jnp.float32),
        "layers": [],   # plain per-layer f32 weights (nn.Linear semantics / reference)
    }
    for l in range(NUM_LAYERS):
        lk = jax.random.split(ks[3 + l], 6)
        layer = {
            "wq": std * jax.random.normal(lk[0], (HIDDEN, HIDDEN), jnp.float32),
            "bq": jnp.zeros((1, HIDDEN), jnp.float32),
            "wk": std * jax.random.normal(lk[1], (HIDDEN, HIDDEN), jnp.float32),
            "bk": jnp.zeros((1, HIDDEN), jnp.float32),
            "wv": std * jax.random.normal(lk[2], (HIDDEN, HIDDEN), jnp.float32),
            "bv": jnp.zeros((1, HIDDEN), jnp.float32),
            "wo": std * jax.random.normal(lk[3], (HIDDEN, HIDDEN), jnp.float32),
            "bo": jnp.zeros((1, HIDDEN), jnp.float32),
            "ln1g": jnp.ones((1, HIDDEN), jnp.float32),
            "ln1b": jnp.zeros((1, HIDDEN), jnp.float32),
            "w1": std * jax.random.normal(lk[4], (HIDDEN, INTERMEDIATE), jnp.float32),
            "b1": jnp.zeros((1, INTERMEDIATE), jnp.float32),
            "w2": std * jax.random.normal(lk[5], (INTERMEDIATE, HIDDEN), jnp.float32),
            "b2": jnp.zeros((1, HIDDEN), jnp.float32),
            "ln2g": jnp.ones((1, HIDDEN), jnp.float32),
            "ln2b": jnp.zeros((1, HIDDEN), jnp.float32),
        }
        params["layers"].append(layer)

    scale = 1.0 / (HEAD_DIM ** 0.5)   # folded into Q weights/bias at pack time

    def stack(fn):
        return jnp.stack([fn(p) for p in params["layers"]], axis=0)

    def pack_small(p):
        # 8 per-layer f32 vectors packed into one (8,128) lane-aligned slab.
        rows = [
            jnp.concatenate([p["bq"] * scale, p["bk"], p["bv"]], axis=1),  # (1,96)
            p["bo"], p["ln1g"], p["ln1b"], p["b1"], p["b2"], p["ln2g"], p["ln2b"],
        ]
        rows = [jnp.pad(r, ((0, 0), (0, 128 - r.shape[1]))) for r in rows]
        return jnp.concatenate(rows, axis=0)                               # (8,128)

    params["stacked"] = {
        "wqkv": stack(lambda p: jnp.concatenate(
            [p["wq"] * scale, p["wk"], p["wv"]], axis=1)).astype(jnp.bfloat16),
        "wo":   stack(lambda p: p["wo"]).astype(jnp.bfloat16),
        "w1":   stack(lambda p: p["w1"]).astype(jnp.bfloat16),
        "w2":   stack(lambda p: p["w2"]).astype(jnp.bfloat16),
        "smallp": stack(pack_small),                      # (L, 8, 128) f32
    }
    return params


# ------------------------------ forward ----------------------------------------
@jax.jit
def bert_forward(input_ids, attention_mask, token_type_ids, params):
    """Returns (last_hidden_state (B,S,H) f32, attention_mask bool (B,S))."""
    B, S = input_ids.shape
    pos_ids = jnp.arange(S, dtype=jnp.int32)

    # Embedding gathers are glue (plain JAX); everything else is one Pallas kernel.
    emb = (params["word_emb"][input_ids]
           + params["pos_emb"][pos_ids][None, :, :]
           + params["type_emb"][token_type_ids])
    emb2d = emb.reshape(B * S, HIDDEN)

    # Additive attention bias: 0 for valid keys, -1e9 for padded keys,
    # expanded to one row per (head, batch) pair: (NH*B, 1, S).
    bias = (1.0 - attention_mask.astype(jnp.float32))[:, None, :] * (-1e9)
    bias = jnp.broadcast_to(bias[None], (NUM_HEADS, B, 1, S)).reshape(
        NUM_HEADS * B, 1, S)

    hidden2d = bert_encoder(emb2d, bias, params["emb_ln_g"], params["emb_ln_b"],
                            params["stacked"])
    return hidden2d.reshape(B, S, HIDDEN), attention_mask.astype(bool)


# ------------------------------ pure-JAX reference -------------------------------
def bert_reference(input_ids, attention_mask, token_type_ids, params):
    B, S = input_ids.shape
    pos_ids = jnp.arange(S, dtype=jnp.int32)
    x = (params["word_emb"][input_ids]
         + params["pos_emb"][pos_ids][None, :, :]
         + params["type_emb"][token_type_ids])
    x = _layer_norm(x, params["emb_ln_g"], params["emb_ln_b"])
    bias = (1.0 - attention_mask.astype(jnp.float32))[:, None, None, :] * (-1e9)
    for p in params["layers"]:
        q = x @ p["wq"] + p["bq"]
        k = x @ p["wk"] + p["bk"]
        v = x @ p["wv"] + p["bv"]

        def split(t):
            return t.reshape(B, S, NUM_HEADS, HEAD_DIM).transpose(0, 2, 1, 3)

        qh, kh, vh = split(q), split(k), split(v)
        s = jnp.einsum('bnqd,bnkd->bnqk', qh, kh) / (HEAD_DIM ** 0.5) + bias
        pr = jax.nn.softmax(s, axis=-1)
        ctx = jnp.einsum('bnqk,bnkd->bnqd', pr, vh)
        ctx = ctx.transpose(0, 2, 1, 3).reshape(B, S, HIDDEN)
        attn = ctx @ p["wo"] + p["bo"]
        x1 = _layer_norm(x + attn, p["ln1g"], p["ln1b"])
        h = _gelu(x1 @ p["w1"] + p["b1"])
        f = h @ p["w2"] + p["b2"]
        x = _layer_norm(x1 + f, p["ln2g"], p["ln2b"])
    return x


# ------------------------------ main ----------------------------------------------
if __name__ == "__main__":
    key = jax.random.PRNGKey(0)
    pkey, dkey = jax.random.split(key)
    params = init_params(pkey)

    # synthetic "tokenized" batch: sequence 0 full length, sequence 1 has 2 pads.
    input_ids = jax.random.randint(dkey, (BATCH, SEQ), 0, VOCAB, dtype=jnp.int32)
    attention_mask = jnp.array([[1, 1, 1, 1, 1, 1, 1, 1],
                                [1, 1, 1, 1, 1, 1, 0, 0]], dtype=jnp.int32)
    input_ids = input_ids * attention_mask  # pad token id = 0
    token_type_ids = jnp.zeros((BATCH, SEQ), dtype=jnp.int32)

    hidden, mask = bert_forward(input_ids, attention_mask, token_type_ids, params)
    jax.block_until_ready((hidden, mask))

    ref = bert_reference(input_ids, attention_mask, token_type_ids, params)
    err = float(jnp.max(jnp.abs(hidden - ref)))

    assert hidden.shape == (BATCH, SEQ, HIDDEN) and hidden.dtype == jnp.float32
    assert mask.shape == (BATCH, SEQ) and mask.dtype == jnp.bool_
    assert bool(jnp.all(jnp.isfinite(hidden)))
    # bf16 matmuls vs f32 reference: generous but bug-catching tolerance.
    assert err < 0.25, f"kernel vs reference max-abs error too large: {err}"
    print("KERNEL_OK")
</pallas_src>

<mosaic_0001>
module attributes {stable_mosaic.version = 11 : i64} {
  func.func @encoder_kernel(%arg0: memref<16x32xf32, #tpu.memory_space<vmem>>, %arg1: memref<8x1x8xf32, #tpu.memory_space<vmem>>, %arg2: memref<1x32xf32, #tpu.memory_space<vmem>>, %arg3: memref<1x32xf32, #tpu.memory_space<vmem>>, %arg4: memref<2x32x96xbf16, #tpu.memory_space<vmem>>, %arg5: memref<2x32x32xbf16, #tpu.memory_space<vmem>>, %arg6: memref<2x32x64xbf16, #tpu.memory_space<vmem>>, %arg7: memref<2x64x32xbf16, #tpu.memory_space<vmem>>, %arg8: memref<2x8x128xf32, #tpu.memory_space<vmem>>, %arg9: memref<16x32xf32, #tpu.memory_space<vmem>>) attributes {dimension_semantics = [], scalar_prefetch = 0 : i64, scratch_operands = 0 : i64, tpu.core_type = #tpu.core_type<tc>} {
    %c0 = arith.constant 0 : index
    %c0_0 = arith.constant 0 : index
    %0 = vector.load %arg0[%c0, %c0_0] : memref<16x32xf32, #tpu.memory_space<vmem>>, vector<16x32xf32>
    %c0_1 = arith.constant 0 : index
    %c0_2 = arith.constant 0 : index
    %1 = vector.load %arg2[%c0_1, %c0_2] : memref<1x32xf32, #tpu.memory_space<vmem>>, vector<1x32xf32>
    %c0_3 = arith.constant 0 : index
    %c0_4 = arith.constant 0 : index
    %2 = vector.load %arg3[%c0_3, %c0_4] : memref<1x32xf32, #tpu.memory_space<vmem>>, vector<1x32xf32>
    %cst = arith.constant dense<0.000000e+00> : vector<16xf32>
    %3 = vector.multi_reduction <add>, %0, %cst [1] : vector<16x32xf32> to vector<16xf32>
    %4 = vector.shape_cast %3 : vector<16xf32> to vector<16x1xf32>
    %cst_5 = arith.constant 3.200000e+01 : f32
    %5 = vector.broadcast %cst_5 : f32 to vector<16x1xf32>
    %6 = arith.divf %4, %5 : vector<16x1xf32>
    %7 = vector.broadcast %6 : vector<16x1xf32> to vector<16x32xf32>
    %8 = arith.subf %0, %7 : vector<16x32xf32>
    %9 = arith.mulf %8, %8 : vector<16x32xf32>
    %cst_6 = arith.constant dense<0.000000e+00> : vector<16xf32>
    %10 = vector.multi_reduction <add>, %9, %cst_6 [1] : vector<16x32xf32> to vector<16xf32>
    %11 = vector.shape_cast %10 : vector<16xf32> to vector<16x1xf32>
    %cst_7 = arith.constant 3.200000e+01 : f32
    %12 = vector.broadcast %cst_7 : f32 to vector<16x1xf32>
    %13 = arith.divf %11, %12 : vector<16x1xf32>
    %14 = vector.broadcast %6 : vector<16x1xf32> to vector<16x32xf32>
    %15 = arith.subf %0, %14 : vector<16x32xf32>
    %cst_8 = arith.constant 9.99999996E-13 : f32
    %16 = vector.broadcast %cst_8 : f32 to vector<16x1xf32>
    %17 = arith.addf %13, %16 : vector<16x1xf32>
    %18 = math.rsqrt %17 : vector<16x1xf32>
    %19 = vector.broadcast %18 : vector<16x1xf32> to vector<16x32xf32>
    %20 = arith.mulf %15, %19 : vector<16x32xf32>
    %21 = vector.broadcast %1 : vector<1x32xf32> to vector<16x32xf32>
    %22 = arith.mulf %20, %21 : vector<16x32xf32>
    %23 = vector.broadcast %2 : vector<1x32xf32> to vector<16x32xf32>
    %24 = arith.addf %22, %23 : vector<16x32xf32>
    %c0_9 = arith.constant 0 : index
    %c0_10 = arith.constant 0 : index
    %c0_11 = arith.constant 0 : index
    %25 = vector.load %arg1[%c0_9, %c0_10, %c0_11] : memref<8x1x8xf32, #tpu.memory_space<vmem>>, vector<8x1x8xf32>
    %c0_12 = arith.constant 0 : index
    %c0_13 = arith.constant 0 : index
    %c0_14 = arith.constant 0 : index
    %26 = vector.load %arg8[%c0_12, %c0_13, %c0_14] : memref<2x8x128xf32, #tpu.memory_space<vmem>>, vector<1x8x128xf32>
    %27 = vector.shape_cast %26 : vector<1x8x128xf32> to vector<8x128xf32>
    %28 = vector.extract_strided_slice %27 {offsets = [0, 0], sizes = [1, 96], strides = [1, 1]} : vector<8x128xf32> to vector<1x96xf32>
    %29 = vector.extract_strided_slice %27 {offsets = [1, 0], sizes = [1, 32], strides = [1, 1]} : vector<8x128xf32> to vector<1x32xf32>
    %30 = vector.extract_strided_slice %27 {offsets = [2, 0], sizes = [1, 32], strides = [1, 1]} : vector<8x128xf32> to vector<1x32xf32>
    %31 = vector.extract_strided_slice %27 {offsets = [3, 0], sizes = [1, 32], strides = [1, 1]} : vector<8x128xf32> to vector<1x32xf32>
    %32 = vector.extract_strided_slice %27 {offsets = [4, 0], sizes = [1, 64], strides = [1, 1]} : vector<8x128xf32> to vector<1x64xf32>
    %33 = vector.extract_strided_slice %27 {offsets = [5, 0], sizes = [1, 32], strides = [1, 1]} : vector<8x128xf32> to vector<1x32xf32>
    %34 = vector.extract_strided_slice %27 {offsets = [6, 0], sizes = [1, 32], strides = [1, 1]} : vector<8x128xf32> to vector<1x32xf32>
    %35 = vector.extract_strided_slice %27 {offsets = [7, 0], sizes = [1, 32], strides = [1, 1]} : vector<8x128xf32> to vector<1x32xf32>
    %36 = arith.truncf %24 : vector<16x32xf32> to vector<16x32xbf16>
    %c0_15 = arith.constant 0 : index
    %c0_16 = arith.constant 0 : index
    %c0_17 = arith.constant 0 : index
    %37 = vector.load %arg4[%c0_15, %c0_16, %c0_17] : memref<2x32x96xbf16, #tpu.memory_space<vmem>>, vector<1x32x96xbf16>
    %38 = vector.shape_cast %37 : vector<1x32x96xbf16> to vector<32x96xbf16>
    %cst_18 = arith.constant dense<0.000000e+00> : vector<16x96xf32>
    %39 = tpu.matmul %36, %38, %cst_18 {dimension_numbers = #tpu.dot_dimension_numbers<[1], [0], [0], [1], [0, 0, 1, 1], [], []>} : vector<16x32xbf16>, vector<32x96xbf16>, vector<16x96xf32> -> vector<16x96xf32>
    %40 = vector.broadcast %28 : vector<1x96xf32> to vector<16x96xf32>
    %41 = arith.addf %39, %40 : vector<16x96xf32>
    %42 = vector.extract_strided_slice %41 {offsets = [0, 0], sizes = [16, 8], strides = [1, 1]} : vector<16x96xf32> to vector<16x8xf32>
    %43 = vector.extract_strided_slice %41 {offsets = [0, 8], sizes = [16, 8], strides = [1, 1]} : vector<16x96xf32> to vector<16x8xf32>
    %44 = vector.extract_strided_slice %41 {offsets = [0, 16], sizes = [16, 8], strides = [1, 1]} : vector<16x96xf32> to vector<16x8xf32>
    %45 = vector.extract_strided_slice %41 {offsets = [0, 24], sizes = [16, 8], strides = [1, 1]} : vector<16x96xf32> to vector<16x8xf32>
    %46 = vector.shape_cast %42 : vector<16x8xf32> to vector<1x16x8xf32>
    %47 = vector.shape_cast %43 : vector<16x8xf32> to vector<1x16x8xf32>
    %48 = vector.shape_cast %44 : vector<16x8xf32> to vector<1x16x8xf32>
    %49 = vector.shape_cast %45 : vector<16x8xf32> to vector<1x16x8xf32>
    %50 = tpu.concatenate %46, %47, %48, %49 in 0 : vector<1x16x8xf32>, vector<1x16x8xf32>, vector<1x16x8xf32>, vector<1x16x8xf32> -> vector<4x16x8xf32>
    %51 = vector.shape_cast %50 : vector<4x16x8xf32> to vector<4x2x8x8xf32>
    %52 = vector.shape_cast %51 : vector<4x2x8x8xf32> to vector<8x8x8xf32>
    %53 = vector.extract_strided_slice %41 {offsets = [0, 32], sizes = [16, 8], strides = [1, 1]} : vector<16x96xf32> to vector<16x8xf32>
    %54 = vector.extract_strided_slice %41 {offsets = [0, 40], sizes = [16, 8], strides = [1, 1]} : vector<16x96xf32> to vector<16x8xf32>
    %55 = vector.extract_strided_slice %41 {offsets = [0, 48], sizes = [16, 8], strides = [1, 1]} : vector<16x96xf32> to vector<16x8xf32>
    %56 = vector.extract_strided_slice %41 {offsets = [0, 56], sizes = [16, 8], strides = [1, 1]} : vector<16x96xf32> to vector<16x8xf32>
    %57 = vector.shape_cast %53 : vector<16x8xf32> to vector<1x16x8xf32>
    %58 = vector.shape_cast %54 : vector<16x8xf32> to vector<1x16x8xf32>
    %59 = vector.shape_cast %55 : vector<16x8xf32> to vector<1x16x8xf32>
    %60 = vector.shape_cast %56 : vector<16x8xf32> to vector<1x16x8xf32>
    %61 = tpu.concatenate %57, %58, %59, %60 in 0 : vector<1x16x8xf32>, vector<1x16x8xf32>, vector<1x16x8xf32>, vector<1x16x8xf32> -> vector<4x16x8xf32>
    %62 = vector.shape_cast %61 : vector<4x16x8xf32> to vector<4x2x8x8xf32>
    %63 = vector.shape_cast %62 : vector<4x2x8x8xf32> to vector<8x8x8xf32>
    %64 = vector.extract_strided_slice %41 {offsets = [0, 64], sizes = [16, 8], strides = [1, 1]} : vector<16x96xf32> to vector<16x8xf32>
    %65 = vector.extract_strided_slice %41 {offsets = [0, 72], sizes = [16, 8], strides = [1, 1]} : vector<16x96xf32> to vector<16x8xf32>
    %66 = vector.extract_strided_slice %41 {offsets = [0, 80], sizes = [16, 8], strides = [1, 1]} : vector<16x96xf32> to vector<16x8xf32>
    %67 = vector.extract_strided_slice %41 {offsets = [0, 88], sizes = [16, 8], strides = [1, 1]} : vector<16x96xf32> to vector<16x8xf32>
    %68 = vector.shape_cast %64 : vector<16x8xf32> to vector<1x16x8xf32>
    %69 = vector.shape_cast %65 : vector<16x8xf32> to vector<1x16x8xf32>
    %70 = vector.shape_cast %66 : vector<16x8xf32> to vector<1x16x8xf32>
    %71 = vector.shape_cast %67 : vector<16x8xf32> to vector<1x16x8xf32>
    %72 = tpu.concatenate %68, %69, %70, %71 in 0 : vector<1x16x8xf32>, vector<1x16x8xf32>, vector<1x16x8xf32>, vector<1x16x8xf32> -> vector<4x16x8xf32>
    %73 = vector.shape_cast %72 : vector<4x16x8xf32> to vector<4x2x8x8xf32>
    %74 = vector.shape_cast %73 : vector<4x2x8x8xf32> to vector<8x8x8xf32>
    %75 = arith.truncf %52 : vector<8x8x8xf32> to vector<8x8x8xbf16>
    %76 = arith.truncf %63 : vector<8x8x8xf32> to vector<8x8x8xbf16>
    "tpu.trace_start"() <{level = 10 : i32, message = "nqd,nkd->nqk"}> : () -> ()
    %cst_19 = arith.constant dense<0.000000e+00> : vector<8x8x8xf32>
    %77 = tpu.matmul %75, %76, %cst_19 {dimension_numbers = #tpu.dot_dimension_numbers<[2], [2], [1], [1], [0, 0, 0, 1, 1, 1], [0], [0]>} : vector<8x8x8xbf16>, vector<8x8x8xbf16>, vector<8x8x8xf32> -> vector<8x8x8xf32>
    "tpu.trace_stop"() : () -> ()
    %78 = vector.broadcast %25 : vector<8x1x8xf32> to vector<8x8x8xf32>
    %79 = arith.addf %77, %78 : vector<8x8x8xf32>
    %cst_20 = arith.constant dense<0xFF800000> : vector<8x8xf32>
    %80 = vector.multi_reduction <maximumf>, %79, %cst_20 [2] : vector<8x8x8xf32> to vector<8x8xf32>
    %81 = vector.shape_cast %80 : vector<8x8xf32> to vector<8x8x1xf32>
    %82 = vector.broadcast %81 : vector<8x8x1xf32> to vector<8x8x8xf32>
    %83 = arith.subf %79, %82 : vector<8x8x8xf32>
    %84 = math.exp %83 : vector<8x8x8xf32>
    %cst_21 = arith.constant dense<0.000000e+00> : vector<8x8xf32>
    %85 = vector.multi_reduction <add>, %84, %cst_21 [2] : vector<8x8x8xf32> to vector<8x8xf32>
    %86 = vector.shape_cast %85 : vector<8x8xf32> to vector<8x8x1xf32>
    %87 = tpu.reciprocal %86 {approx = true} : vector<8x8x1xf32> -> vector<8x8x1xf32>
    %88 = vector.broadcast %87 : vector<8x8x1xf32> to vector<8x8x8xf32>
    %89 = arith.mulf %84, %88 : vector<8x8x8xf32>
    %90 = arith.truncf %89 : vector<8x8x8xf32> to vector<8x8x8xbf16>
    %91 = arith.truncf %74 : vector<8x8x8xf32> to vector<8x8x8xbf16>
    "tpu.trace_start"() <{level = 10 : i32, message = "nqk,nkd->nqd"}> : () -> ()
    %cst_22 = arith.constant dense<0.000000e+00> : vector<8x8x8xf32>
    %92 = tpu.matmul %90, %91, %cst_22 {dimension_numbers = #tpu.dot_dimension_numbers<[2], [1], [1], [2], [0, 0, 0, 1, 1, 2], [0], [0]>} : vector<8x8x8xbf16>, vector<8x8x8xbf16>, vector<8x8x8xf32> -> vector<8x8x8xf32>
    "tpu.trace_stop"() : () -> ()
    %93 = vector.shape_cast %92 : vector<8x8x8xf32> to vector<4x2x8x8xf32>
    %94 = vector.shape_cast %93 : vector<4x2x8x8xf32> to vector<4x16x8xf32>
    %95 = vector.extract_strided_slice %94 {offsets = [0, 0, 0], sizes = [1, 16, 8], strides = [1, 1, 1]} : vector<4x16x8xf32> to vector<1x16x8xf32>
    %96 = vector.shape_cast %95 : vector<1x16x8xf32> to vector<16x8xf32>
    %97 = vector.extract_strided_slice %94 {offsets = [1, 0, 0], sizes = [1, 16, 8], strides = [1, 1, 1]} : vector<4x16x8xf32> to vector<1x16x8xf32>
    %98 = vector.shape_cast %97 : vector<1x16x8xf32> to vector<16x8xf32>
    %99 = vector.extract_strided_slice %94 {offsets = [2, 0, 0], sizes = [1, 16, 8], strides = [1, 1, 1]} : vector<4x16x8xf32> to vector<1x16x8xf32>
    %100 = vector.shape_cast %99 : vector<1x16x8xf32> to vector<16x8xf32>
    %101 = vector.extract_strided_slice %94 {offsets = [3, 0, 0], sizes = [1, 16, 8], strides = [1, 1, 1]} : vector<4x16x8xf32> to vector<1x16x8xf32>
    %102 = vector.shape_cast %101 : vector<1x16x8xf32> to vector<16x8xf32>
    %103 = tpu.concatenate %96, %98, %100, %102 in 1 : vector<16x8xf32>, vector<16x8xf32>, vector<16x8xf32>, vector<16x8xf32> -> vector<16x32xf32>
    %104 = arith.truncf %103 : vector<16x32xf32> to vector<16x32xbf16>
    %c0_23 = arith.constant 0 : index
    %c0_24 = arith.constant 0 : index
    %c0_25 = arith.constant 0 : index
    %105 = vector.load %arg5[%c0_23, %c0_24, %c0_25] : memref<2x32x32xbf16, #tpu.memory_space<vmem>>, vector<1x32x32xbf16>
    %106 = vector.shape_cast %105 : vector<1x32x32xbf16> to vector<32x32xbf16>
    %cst_26 = arith.constant dense<0.000000e+00> : vector<16x32xf32>
    %107 = tpu.matmul %104, %106, %cst_26 {dimension_numbers = #tpu.dot_dimension_numbers<[1], [0], [0], [1], [0, 0, 1, 1], [], []>} : vector<16x32xbf16>, vector<32x32xbf16>, vector<16x32xf32> -> vector<16x32xf32>
    %108 = vector.broadcast %29 : vector<1x32xf32> to vector<16x32xf32>
    %109 = arith.addf %107, %108 : vector<16x32xf32>
    %110 = arith.addf %24, %109 : vector<16x32xf32>
    %cst_27 = arith.constant dense<0.000000e+00> : vector<16xf32>
    %111 = vector.multi_reduction <add>, %110, %cst_27 [1] : vector<16x32xf32> to vector<16xf32>
    %112 = vector.shape_cast %111 : vector<16xf32> to vector<16x1xf32>
    %cst_28 = arith.constant 3.200000e+01 : f32
    %113 = vector.broadcast %cst_28 : f32 to vector<16x1xf32>
    %114 = arith.divf %112, %113 : vector<16x1xf32>
    %115 = vector.broadcast %114 : vector<16x1xf32> to vector<16x32xf32>
    %116 = arith.subf %110, %115 : vector<16x32xf32>
    %117 = arith.mulf %116, %116 : vector<16x32xf32>
    %cst_29 = arith.constant dense<0.000000e+00> : vector<16xf32>
    %118 = vector.multi_reduction <add>, %117, %cst_29 [1] : vector<16x32xf32> to vector<16xf32>
    %119 = vector.shape_cast %118 : vector<16xf32> to vector<16x1xf32>
    %cst_30 = arith.constant 3.200000e+01 : f32
    %120 = vector.broadcast %cst_30 : f32 to vector<16x1xf32>
    %121 = arith.divf %119, %120 : vector<16x1xf32>
    %122 = vector.broadcast %114 : vector<16x1xf32> to vector<16x32xf32>
    %123 = arith.subf %110, %122 : vector<16x32xf32>
    %cst_31 = arith.constant 9.99999996E-13 : f32
    %124 = vector.broadcast %cst_31 : f32 to vector<16x1xf32>
    %125 = arith.addf %121, %124 : vector<16x1xf32>
    %126 = math.rsqrt %125 : vector<16x1xf32>
    %127 = vector.broadcast %126 : vector<16x1xf32> to vector<16x32xf32>
    %128 = arith.mulf %123, %127 : vector<16x32xf32>
    %129 = vector.broadcast %30 : vector<1x32xf32> to vector<16x32xf32>
    %130 = arith.mulf %128, %129 : vector<16x32xf32>
    %131 = vector.broadcast %31 : vector<1x32xf32> to vector<16x32xf32>
    %132 = arith.addf %130, %131 : vector<16x32xf32>
    %133 = arith.truncf %132 : vector<16x32xf32> to vector<16x32xbf16>
    %c0_32 = arith.constant 0 : index
    %c0_33 = arith.constant 0 : index
    %c0_34 = arith.constant 0 : index
    %134 = vector.load %arg6[%c0_32, %c0_33, %c0_34] : memref<2x32x64xbf16, #tpu.memory_space<vmem>>, vector<1x32x64xbf16>
    %135 = vector.shape_cast %134 : vector<1x32x64xbf16> to vector<32x64xbf16>
    %cst_35 = arith.constant dense<0.000000e+00> : vector<16x64xf32>
    %136 = tpu.matmul %133, %135, %cst_35 {dimension_numbers = #tpu.dot_dimension_numbers<[1], [0], [0], [1], [0, 0, 1, 1], [], []>} : vector<16x32xbf16>, vector<32x64xbf16>, vector<16x64xf32> -> vector<16x64xf32>
    %137 = vector.broadcast %32 : vector<1x64xf32> to vector<16x64xf32>
    %138 = arith.addf %136, %137 : vector<16x64xf32>
    %cst_36 = arith.constant 5.000000e-01 : f32
    %139 = vector.broadcast %cst_36 : f32 to vector<16x64xf32>
    %140 = arith.mulf %139, %138 : vector<16x64xf32>
    %cst_37 = arith.constant 4.471500e-02 : f32
    %141 = vector.broadcast %cst_37 : f32 to vector<16x64xf32>
    %142 = arith.mulf %141, %138 : vector<16x64xf32>
    %143 = arith.mulf %142, %138 : vector<16x64xf32>
    %144 = arith.mulf %143, %138 : vector<16x64xf32>
    %145 = arith.addf %138, %144 : vector<16x64xf32>
    %cst_38 = arith.constant 0.797884583 : f32
    %146 = vector.broadcast %cst_38 : f32 to vector<16x64xf32>
    %147 = arith.mulf %146, %145 : vector<16x64xf32>
    %148 = math.tanh %147 : vector<16x64xf32>
    %cst_39 = arith.constant 1.000000e+00 : f32
    %149 = vector.broadcast %cst_39 : f32 to vector<16x64xf32>
    %150 = arith.addf %149, %148 : vector<16x64xf32>
    %151 = arith.mulf %140, %150 : vector<16x64xf32>
    %152 = arith.truncf %151 : vector<16x64xf32> to vector<16x64xbf16>
    %c0_40 = arith.constant 0 : index
    %c0_41 = arith.constant 0 : index
    %c0_42 = arith.constant 0 : index
    %153 = vector.load %arg7[%c0_40, %c0_41, %c0_42] : memref<2x64x32xbf16, #tpu.memory_space<vmem>>, vector<1x64x32xbf16>
    %154 = vector.shape_cast %153 : vector<1x64x32xbf16> to vector<64x32xbf16>
    %cst_43 = arith.constant dense<0.000000e+00> : vector<16x32xf32>
    %155 = tpu.matmul %152, %154, %cst_43 {dimension_numbers = #tpu.dot_dimension_numbers<[1], [0], [0], [1], [0, 0, 1, 1], [], []>} : vector<16x64xbf16>, vector<64x32xbf16>, vector<16x32xf32> -> vector<16x32xf32>
    %156 = vector.broadcast %33 : vector<1x32xf32> to vector<16x32xf32>
    %157 = arith.addf %155, %156 : vector<16x32xf32>
    %158 = arith.addf %132, %157 : vector<16x32xf32>
    %cst_44 = arith.constant dense<0.000000e+00> : vector<16xf32>
    %159 = vector.multi_reduction <add>, %158, %cst_44 [1] : vector<16x32xf32> to vector<16xf32>
    %160 = vector.shape_cast %159 : vector<16xf32> to vector<16x1xf32>
    %cst_45 = arith.constant 3.200000e+01 : f32
    %161 = vector.broadcast %cst_45 : f32 to vector<16x1xf32>
    %162 = arith.divf %160, %161 : vector<16x1xf32>
    %163 = vector.broadcast %162 : vector<16x1xf32> to vector<16x32xf32>
    %164 = arith.subf %158, %163 : vector<16x32xf32>
    %165 = arith.mulf %164, %164 : vector<16x32xf32>
    %cst_46 = arith.constant dense<0.000000e+00> : vector<16xf32>
    %166 = vector.multi_reduction <add>, %165, %cst_46 [1] : vector<16x32xf32> to vector<16xf32>
    %167 = vector.shape_cast %166 : vector<16xf32> to vector<16x1xf32>
    %cst_47 = arith.constant 3.200000e+01 : f32
    %168 = vector.broadcast %cst_47 : f32 to vector<16x1xf32>
    %169 = arith.divf %167, %168 : vector<16x1xf32>
    %170 = vector.broadcast %162 : vector<16x1xf32> to vector<16x32xf32>
    %171 = arith.subf %158, %170 : vector<16x32xf32>
    %cst_48 = arith.constant 9.99999996E-13 : f32
    %172 = vector.broadcast %cst_48 : f32 to vector<16x1xf32>
    %173 = arith.addf %169, %172 : vector<16x1xf32>
    %174 = math.rsqrt %173 : vector<16x1xf32>
    %175 = vector.broadcast %174 : vector<16x1xf32> to vector<16x32xf32>
    %176 = arith.mulf %171, %175 : vector<16x32xf32>
    %177 = vector.broadcast %34 : vector<1x32xf32> to vector<16x32xf32>
    %178 = arith.mulf %176, %177 : vector<16x32xf32>
    %179 = vector.broadcast %35 : vector<1x32xf32> to vector<16x32xf32>
    %180 = arith.addf %178, %179 : vector<16x32xf32>
    %c1 = arith.constant 1 : index
    %c0_49 = arith.constant 0 : index
    %c0_50 = arith.constant 0 : index
    %181 = vector.load %arg8[%c1, %c0_49, %c0_50] : memref<2x8x128xf32, #tpu.memory_space<vmem>>, vector<1x8x128xf32>
    %182 = vector.shape_cast %181 : vector<1x8x128xf32> to vector<8x128xf32>
    %183 = vector.extract_strided_slice %182 {offsets = [0, 0], sizes = [1, 96], strides = [1, 1]} : vector<8x128xf32> to vector<1x96xf32>
    %184 = vector.extract_strided_slice %182 {offsets = [1, 0], sizes = [1, 32], strides = [1, 1]} : vector<8x128xf32> to vector<1x32xf32>
    %185 = vector.extract_strided_slice %182 {offsets = [2, 0], sizes = [1, 32], strides = [1, 1]} : vector<8x128xf32> to vector<1x32xf32>
    %186 = vector.extract_strided_slice %182 {offsets = [3, 0], sizes = [1, 32], strides = [1, 1]} : vector<8x128xf32> to vector<1x32xf32>
    %187 = vector.extract_strided_slice %182 {offsets = [4, 0], sizes = [1, 64], strides = [1, 1]} : vector<8x128xf32> to vector<1x64xf32>
    %188 = vector.extract_strided_slice %182 {offsets = [5, 0], sizes = [1, 32], strides = [1, 1]} : vector<8x128xf32> to vector<1x32xf32>
    %189 = vector.extract_strided_slice %182 {offsets = [6, 0], sizes = [1, 32], strides = [1, 1]} : vector<8x128xf32> to vector<1x32xf32>
    %190 = vector.extract_strided_slice %182 {offsets = [7, 0], sizes = [1, 32], strides = [1, 1]} : vector<8x128xf32> to vector<1x32xf32>
    %191 = arith.truncf %180 : vector<16x32xf32> to vector<16x32xbf16>
    %c1_51 = arith.constant 1 : index
    %c0_52 = arith.constant 0 : index
    %c0_53 = arith.constant 0 : index
    %192 = vector.load %arg4[%c1_51, %c0_52, %c0_53] : memref<2x32x96xbf16, #tpu.memory_space<vmem>>, vector<1x32x96xbf16>
    %193 = vector.shape_cast %192 : vector<1x32x96xbf16> to vector<32x96xbf16>
    %cst_54 = arith.constant dense<0.000000e+00> : vector<16x96xf32>
    %194 = tpu.matmul %191, %193, %cst_54 {dimension_numbers = #tpu.dot_dimension_numbers<[1], [0], [0], [1], [0, 0, 1, 1], [], []>} : vector<16x32xbf16>, vector<32x96xbf16>, vector<16x96xf32> -> vector<16x96xf32>
    %195 = vector.broadcast %183 : vector<1x96xf32> to vector<16x96xf32>
    %196 = arith.addf %194, %195 : vector<16x96xf32>
    %197 = vector.extract_strided_slice %196 {offsets = [0, 0], sizes = [16, 8], strides = [1, 1]} : vector<16x96xf32> to vector<16x8xf32>
    %198 = vector.extract_strided_slice %196 {offsets = [0, 8], sizes = [16, 8], strides = [1, 1]} : vector<16x96xf32> to vector<16x8xf32>
    %199 = vector.extract_strided_slice %196 {offsets = [0, 16], sizes = [16, 8], strides = [1, 1]} : vector<16x96xf32> to vector<16x8xf32>
    %200 = vector.extract_strided_slice %196 {offsets = [0, 24], sizes = [16, 8], strides = [1, 1]} : vector<16x96xf32> to vector<16x8xf32>
    %201 = vector.shape_cast %197 : vector<16x8xf32> to vector<1x16x8xf32>
    %202 = vector.shape_cast %198 : vector<16x8xf32> to vector<1x16x8xf32>
    %203 = vector.shape_cast %199 : vector<16x8xf32> to vector<1x16x8xf32>
    %204 = vector.shape_cast %200 : vector<16x8xf32> to vector<1x16x8xf32>
    %205 = tpu.concatenate %201, %202, %203, %204 in 0 : vector<1x16x8xf32>, vector<1x16x8xf32>, vector<1x16x8xf32>, vector<1x16x8xf32> -> vector<4x16x8xf32>
    %206 = vector.shape_cast %205 : vector<4x16x8xf32> to vector<4x2x8x8xf32>
    %207 = vector.shape_cast %206 : vector<4x2x8x8xf32> to vector<8x8x8xf32>
    %208 = vector.extract_strided_slice %196 {offsets = [0, 32], sizes = [16, 8], strides = [1, 1]} : vector<16x96xf32> to vector<16x8xf32>
    %209 = vector.extract_strided_slice %196 {offsets = [0, 40], sizes = [16, 8], strides = [1, 1]} : vector<16x96xf32> to vector<16x8xf32>
    %210 = vector.extract_strided_slice %196 {offsets = [0, 48], sizes = [16, 8], strides = [1, 1]} : vector<16x96xf32> to vector<16x8xf32>
    %211 = vector.extract_strided_slice %196 {offsets = [0, 56], sizes = [16, 8], strides = [1, 1]} : vector<16x96xf32> to vector<16x8xf32>
    %212 = vector.shape_cast %208 : vector<16x8xf32> to vector<1x16x8xf32>
    %213 = vector.shape_cast %209 : vector<16x8xf32> to vector<1x16x8xf32>
    %214 = vector.shape_cast %210 : vector<16x8xf32> to vector<1x16x8xf32>
    %215 = vector.shape_cast %211 : vector<16x8xf32> to vector<1x16x8xf32>
    %216 = tpu.concatenate %212, %213, %214, %215 in 0 : vector<1x16x8xf32>, vector<1x16x8xf32>, vector<1x16x8xf32>, vector<1x16x8xf32> -> vector<4x16x8xf32>
    %217 = vector.shape_cast %216 : vector<4x16x8xf32> to vector<4x2x8x8xf32>
    %218 = vector.shape_cast %217 : vector<4x2x8x8xf32> to vector<8x8x8xf32>
    %219 = vector.extract_strided_slice %196 {offsets = [0, 64], sizes = [16, 8], strides = [1, 1]} : vector<16x96xf32> to vector<16x8xf32>
    %220 = vector.extract_strided_slice %196 {offsets = [0, 72], sizes = [16, 8], strides = [1, 1]} : vector<16x96xf32> to vector<16x8xf32>
    %221 = vector.extract_strided_slice %196 {offsets = [0, 80], sizes = [16, 8], strides = [1, 1]} : vector<16x96xf32> to vector<16x8xf32>
    %222 = vector.extract_strided_slice %196 {offsets = [0, 88], sizes = [16, 8], strides = [1, 1]} : vector<16x96xf32> to vector<16x8xf32>
    %223 = vector.shape_cast %219 : vector<16x8xf32> to vector<1x16x8xf32>
    %224 = vector.shape_cast %220 : vector<16x8xf32> to vector<1x16x8xf32>
    %225 = vector.shape_cast %221 : vector<16x8xf32> to vector<1x16x8xf32>
    %226 = vector.shape_cast %222 : vector<16x8xf32> to vector<1x16x8xf32>
    %227 = tpu.concatenate %223, %224, %225, %226 in 0 : vector<1x16x8xf32>, vector<1x16x8xf32>, vector<1x16x8xf32>, vector<1x16x8xf32> -> vector<4x16x8xf32>
    %228 = vector.shape_cast %227 : vector<4x16x8xf32> to vector<4x2x8x8xf32>
    %229 = vector.shape_cast %228 : vector<4x2x8x8xf32> to vector<8x8x8xf32>
    %230 = arith.truncf %207 : vector<8x8x8xf32> to vector<8x8x8xbf16>
    %231 = arith.truncf %218 : vector<8x8x8xf32> to vector<8x8x8xbf16>
    "tpu.trace_start"() <{level = 10 : i32, message = "nqd,nkd->nqk"}> : () -> ()
    %cst_55 = arith.constant dense<0.000000e+00> : vector<8x8x8xf32>
    %232 = tpu.matmul %230, %231, %cst_55 {dimension_numbers = #tpu.dot_dimension_numbers<[2], [2], [1], [1], [0, 0, 0, 1, 1, 1], [0], [0]>} : vector<8x8x8xbf16>, vector<8x8x8xbf16>, vector<8x8x8xf32> -> vector<8x8x8xf32>
    "tpu.trace_stop"() : () -> ()
    %233 = vector.broadcast %25 : vector<8x1x8xf32> to vector<8x8x8xf32>
    %234 = arith.addf %232, %233 : vector<8x8x8xf32>
    %cst_56 = arith.constant dense<0xFF800000> : vector<8x8xf32>
    %235 = vector.multi_reduction <maximumf>, %234, %cst_56 [2] : vector<8x8x8xf32> to vector<8x8xf32>
    %236 = vector.shape_cast %235 : vector<8x8xf32> to vector<8x8x1xf32>
    %237 = vector.broadcast %236 : vector<8x8x1xf32> to vector<8x8x8xf32>
    %238 = arith.subf %234, %237 : vector<8x8x8xf32>
    %239 = math.exp %238 : vector<8x8x8xf32>
    %cst_57 = arith.constant dense<0.000000e+00> : vector<8x8xf32>
    %240 = vector.multi_reduction <add>, %239, %cst_57 [2] : vector<8x8x8xf32> to vector<8x8xf32>
    %241 = vector.shape_cast %240 : vector<8x8xf32> to vector<8x8x1xf32>
    %242 = tpu.reciprocal %241 {approx = true} : vector<8x8x1xf32> -> vector<8x8x1xf32>
    %243 = vector.broadcast %242 : vector<8x8x1xf32> to vector<8x8x8xf32>
    %244 = arith.mulf %239, %243 : vector<8x8x8xf32>
    %245 = arith.truncf %244 : vector<8x8x8xf32> to vector<8x8x8xbf16>
    %246 = arith.truncf %229 : vector<8x8x8xf32> to vector<8x8x8xbf16>
    "tpu.trace_start"() <{level = 10 : i32, message = "nqk,nkd->nqd"}> : () -> ()
    %cst_58 = arith.constant dense<0.000000e+00> : vector<8x8x8xf32>
    %247 = tpu.matmul %245, %246, %cst_58 {dimension_numbers = #tpu.dot_dimension_numbers<[2], [1], [1], [2], [0, 0, 0, 1, 1, 2], [0], [0]>} : vector<8x8x8xbf16>, vector<8x8x8xbf16>, vector<8x8x8xf32> -> vector<8x8x8xf32>
    "tpu.trace_stop"() : () -> ()
    %248 = vector.shape_cast %247 : vector<8x8x8xf32> to vector<4x2x8x8xf32>
    %249 = vector.shape_cast %248 : vector<4x2x8x8xf32> to vector<4x16x8xf32>
    %250 = vector.extract_strided_slice %249 {offsets = [0, 0, 0], sizes = [1, 16, 8], strides = [1, 1, 1]} : vector<4x16x8xf32> to vector<1x16x8xf32>
    %251 = vector.shape_cast %250 : vector<1x16x8xf32> to vector<16x8xf32>
    %252 = vector.extract_strided_slice %249 {offsets = [1, 0, 0], sizes = [1, 16, 8], strides = [1, 1, 1]} : vector<4x16x8xf32> to vector<1x16x8xf32>
    %253 = vector.shape_cast %252 : vector<1x16x8xf32> to vector<16x8xf32>
    %254 = vector.extract_strided_slice %249 {offsets = [2, 0, 0], sizes = [1, 16, 8], strides = [1, 1, 1]} : vector<4x16x8xf32> to vector<1x16x8xf32>
    %255 = vector.shape_cast %254 : vector<1x16x8xf32> to vector<16x8xf32>
    %256 = vector.extract_strided_slice %249 {offsets = [3, 0, 0], sizes = [1, 16, 8], strides = [1, 1, 1]} : vector<4x16x8xf32> to vector<1x16x8xf32>
    %257 = vector.shape_cast %256 : vector<1x16x8xf32> to vector<16x8xf32>
    %258 = tpu.concatenate %251, %253, %255, %257 in 1 : vector<16x8xf32>, vector<16x8xf32>, vector<16x8xf32>, vector<16x8xf32> -> vector<16x32xf32>
    %259 = arith.truncf %258 : vector<16x32xf32> to vector<16x32xbf16>
    %c1_59 = arith.constant 1 : index
    %c0_60 = arith.constant 0 : index
    %c0_61 = arith.constant 0 : index
    %260 = vector.load %arg5[%c1_59, %c0_60, %c0_61] : memref<2x32x32xbf16, #tpu.memory_space<vmem>>, vector<1x32x32xbf16>
    %261 = vector.shape_cast %260 : vector<1x32x32xbf16> to vector<32x32xbf16>
    %cst_62 = arith.constant dense<0.000000e+00> : vector<16x32xf32>
    %262 = tpu.matmul %259, %261, %cst_62 {dimension_numbers = #tpu.dot_dimension_numbers<[1], [0], [0], [1], [0, 0, 1, 1], [], []>} : vector<16x32xbf16>, vector<32x32xbf16>, vector<16x32xf32> -> vector<16x32xf32>
    %263 = vector.broadcast %184 : vector<1x32xf32> to vector<16x32xf32>
    %264 = arith.addf %262, %263 : vector<16x32xf32>
    %265 = arith.addf %180, %264 : vector<16x32xf32>
    %cst_63 = arith.constant dense<0.000000e+00> : vector<16xf32>
    %266 = vector.multi_reduction <add>, %265, %cst_63 [1] : vector<16x32xf32> to vector<16xf32>
    %267 = vector.shape_cast %266 : vector<16xf32> to vector<16x1xf32>
    %cst_64 = arith.constant 3.200000e+01 : f32
    %268 = vector.broadcast %cst_64 : f32 to vector<16x1xf32>
    %269 = arith.divf %267, %268 : vector<16x1xf32>
    %270 = vector.broadcast %269 : vector<16x1xf32> to vector<16x32xf32>
    %271 = arith.subf %265, %270 : vector<16x32xf32>
    %272 = arith.mulf %271, %271 : vector<16x32xf32>
    %cst_65 = arith.constant dense<0.000000e+00> : vector<16xf32>
    %273 = vector.multi_reduction <add>, %272, %cst_65 [1] : vector<16x32xf32> to vector<16xf32>
    %274 = vector.shape_cast %273 : vector<16xf32> to vector<16x1xf32>
    %cst_66 = arith.constant 3.200000e+01 : f32
    %275 = vector.broadcast %cst_66 : f32 to vector<16x1xf32>
    %276 = arith.divf %274, %275 : vector<16x1xf32>
    %277 = vector.broadcast %269 : vector<16x1xf32> to vector<16x32xf32>
    %278 = arith.subf %265, %277 : vector<16x32xf32>
    %cst_67 = arith.constant 9.99999996E-13 : f32
    %279 = vector.broadcast %cst_67 : f32 to vector<16x1xf32>
    %280 = arith.addf %276, %279 : vector<16x1xf32>
    %281 = math.rsqrt %280 : vector<16x1xf32>
    %282 = vector.broadcast %281 : vector<16x1xf32> to vector<16x32xf32>
    %283 = arith.mulf %278, %282 : vector<16x32xf32>
    %284 = vector.broadcast %185 : vector<1x32xf32> to vector<16x32xf32>
    %285 = arith.mulf %283, %284 : vector<16x32xf32>
    %286 = vector.broadcast %186 : vector<1x32xf32> to vector<16x32xf32>
    %287 = arith.addf %285, %286 : vector<16x32xf32>
    %288 = arith.truncf %287 : vector<16x32xf32> to vector<16x32xbf16>
    %c1_68 = arith.constant 1 : index
    %c0_69 = arith.constant 0 : index
    %c0_70 = arith.constant 0 : index
    %289 = vector.load %arg6[%c1_68, %c0_69, %c0_70] : memref<2x32x64xbf16, #tpu.memory_space<vmem>>, vector<1x32x64xbf16>
    %290 = vector.shape_cast %289 : vector<1x32x64xbf16> to vector<32x64xbf16>
    %cst_71 = arith.constant dense<0.000000e+00> : vector<16x64xf32>
    %291 = tpu.matmul %288, %290, %cst_71 {dimension_numbers = #tpu.dot_dimension_numbers<[1], [0], [0], [1], [0, 0, 1, 1], [], []>} : vector<16x32xbf16>, vector<32x64xbf16>, vector<16x64xf32> -> vector<16x64xf32>
    %292 = vector.broadcast %187 : vector<1x64xf32> to vector<16x64xf32>
    %293 = arith.addf %291, %292 : vector<16x64xf32>
    %cst_72 = arith.constant 5.000000e-01 : f32
    %294 = vector.broadcast %cst_72 : f32 to vector<16x64xf32>
    %295 = arith.mulf %294, %293 : vector<16x64xf32>
    %cst_73 = arith.constant 4.471500e-02 : f32
    %296 = vector.broadcast %cst_73 : f32 to vector<16x64xf32>
    %297 = arith.mulf %296, %293 : vector<16x64xf32>
    %298 = arith.mulf %297, %293 : vector<16x64xf32>
    %299 = arith.mulf %298, %293 : vector<16x64xf32>
    %300 = arith.addf %293, %299 : vector<16x64xf32>
    %cst_74 = arith.constant 0.797884583 : f32
    %301 = vector.broadcast %cst_74 : f32 to vector<16x64xf32>
    %302 = arith.mulf %301, %300 : vector<16x64xf32>
    %303 = math.tanh %302 : vector<16x64xf32>
    %cst_75 = arith.constant 1.000000e+00 : f32
    %304 = vector.broadcast %cst_75 : f32 to vector<16x64xf32>
    %305 = arith.addf %304, %303 : vector<16x64xf32>
    %306 = arith.mulf %295, %305 : vector<16x64xf32>
    %307 = arith.truncf %306 : vector<16x64xf32> to vector<16x64xbf16>
    %c1_76 = arith.constant 1 : index
    %c0_77 = arith.constant 0 : index
    %c0_78 = arith.constant 0 : index
    %308 = vector.load %arg7[%c1_76, %c0_77, %c0_78] : memref<2x64x32xbf16, #tpu.memory_space<vmem>>, vector<1x64x32xbf16>
    %309 = vector.shape_cast %308 : vector<1x64x32xbf16> to vector<64x32xbf16>
    %cst_79 = arith.constant dense<0.000000e+00> : vector<16x32xf32>
    %310 = tpu.matmul %307, %309, %cst_79 {dimension_numbers = #tpu.dot_dimension_numbers<[1], [0], [0], [1], [0, 0, 1, 1], [], []>} : vector<16x64xbf16>, vector<64x32xbf16>, vector<16x32xf32> -> vector<16x32xf32>
    %311 = vector.broadcast %188 : vector<1x32xf32> to vector<16x32xf32>
    %312 = arith.addf %310, %311 : vector<16x32xf32>
    %313 = arith.addf %287, %312 : vector<16x32xf32>
    %cst_80 = arith.constant dense<0.000000e+00> : vector<16xf32>
    %314 = vector.multi_reduction <add>, %313, %cst_80 [1] : vector<16x32xf32> to vector<16xf32>
    %315 = vector.shape_cast %314 : vector<16xf32> to vector<16x1xf32>
    %cst_81 = arith.constant 3.200000e+01 : f32
    %316 = vector.broadcast %cst_81 : f32 to vector<16x1xf32>
    %317 = arith.divf %315, %316 : vector<16x1xf32>
    %318 = vector.broadcast %317 : vector<16x1xf32> to vector<16x32xf32>
    %319 = arith.subf %313, %318 : vector<16x32xf32>
    %320 = arith.mulf %319, %319 : vector<16x32xf32>
    %cst_82 = arith.constant dense<0.000000e+00> : vector<16xf32>
    %321 = vector.multi_reduction <add>, %320, %cst_82 [1] : vector<16x32xf32> to vector<16xf32>
    %322 = vector.shape_cast %321 : vector<16xf32> to vector<16x1xf32>
    %cst_83 = arith.constant 3.200000e+01 : f32
    %323 = vector.broadcast %cst_83 : f32 to vector<16x1xf32>
    %324 = arith.divf %322, %323 : vector<16x1xf32>
    %325 = vector.broadcast %317 : vector<16x1xf32> to vector<16x32xf32>
    %326 = arith.subf %313, %325 : vector<16x32xf32>
    %cst_84 = arith.constant 9.99999996E-13 : f32
    %327 = vector.broadcast %cst_84 : f32 to vector<16x1xf32>
    %328 = arith.addf %324, %327 : vector<16x1xf32>
    %329 = math.rsqrt %328 : vector<16x1xf32>
    %330 = vector.broadcast %329 : vector<16x1xf32> to vector<16x32xf32>
    %331 = arith.mulf %326, %330 : vector<16x32xf32>
    %332 = vector.broadcast %189 : vector<1x32xf32> to vector<16x32xf32>
    %333 = arith.mulf %331, %332 : vector<16x32xf32>
    %334 = vector.broadcast %190 : vector<1x32xf32> to vector<16x32xf32>
    %335 = arith.addf %333, %334 : vector<16x32xf32>
    %c0_85 = arith.constant 0 : index
    %c0_86 = arith.constant 0 : index
    %336 = vector.load %arg9[%c0_85, %c0_86] : memref<16x32xf32, #tpu.memory_space<vmem>>, vector<16x32xf32>
    tpu.vector_store %arg9[%c0_85, %c0_86], %335 {strides = array<i32>} : memref<16x32xf32, #tpu.memory_space<vmem>>, vector<16x32xf32>,
    return
  }
}

</mosaic_0001>

<bundles_post_ra>
// kernel: bert_forward.1
= control target key start
LH: loop header
LB: loop body
LE: loop exit
PB: predicated region body
PF: predicated region fallthrough
CT: control target
= control target key end

     0   :  { %vm38_vm0 = vcmask 261120   ;;  %s2589_s0 = inlined_call_operand.vmem [shape: f32[16,32], index: 0, kind: input, shape index: {}]   ;;  %s2590_s1 = inlined_call_operand.vmem [shape: f32[8,1,8], index: 1, kind: input, shape index: {}]   ;;  %s2591_s2 = inlined_call_operand.vmem [shape: f32[1,32], index: 2, kind: input, shape index: {}]   ;;  %s2592_s3 = inlined_call_operand.vmem [shape: f32[1,32], index: 3, kind: input, shape index: {}]   ;;  %s2593_s4 = inlined_call_operand.vmem [shape: bf16[2,32,96], index: 4, kind: input, shape index: {}]   ;;  %s2594_s5 = inlined_call_operand.vmem [shape: bf16[2,32,32], index: 5, kind: input, shape index: {}]   ;;  %s2595_s6 = inlined_call_operand.vmem [shape: bf16[2,32,64], index: 6, kind: input, shape index: {}]   ;;  %s2596_s7 = inlined_call_operand.vmem [shape: bf16[2,64,32], index: 7, kind: input, shape index: {}]   ;;  %s2597_s8 = inlined_call_operand.vmem [shape: f32[2,8,128], index: 8, kind: input, shape index: {}]   ;;  %s2598_s9 = inlined_call_operand.hbm [shape: f32[16,32], index: 9, kind: output, shape index: {}]  }
   0x1   :  { %v34_v0 = vld [vmem:[%s2589_s0] sm:$0xff]  ;;  %v35_v2 = vld [vmem:[%s2589_s0 + $0x8] sm:$0xff] }
   0x2   :  { %v39_v1 = vsel %vm38_vm0, %v34_v0, 0.0 }
   0x3   :  { %40 = vadd.xlane.f32.xlu0 %v39_v1 }
   0x4   :  { %14 = vsyncpa [#allocation3], 0  ;;  %v42_v3 = vsel %vm38_vm0, %v35_v2, 0.0  ;;  %v2080_v4 = vmov 32.0   ;;  %v1890_v21 = vld [vmem:[%s2593_s4 + $0x8] sm:$0xff]  ;;  %v1889_v23 = vld [vmem:[%s2593_s4] sm:$0xff] }
   0x5   :  { %1960 = vrcp.f32 %v2080_v4  ;;  %136 = vmatpush.bf16.msra.mxu0 %v1890_v21  ;;  %v1950_v42 = vld [vmem:[%s2591_s2] ss:$0 sm:$0xff]  ;;  %s2082_s21 = smov 120   ;;  %s2083_s22 = smov 112   ;;  %vm201_vm8 = vcmask 64512   ;;  %vm490_vm9 = vcmask 1043456  }
   0x6   :  { %v1951_v47 = vld [vmem:[%s2592_s3] ss:$0 sm:$0xff]  ;;  %s2081_s3 = smov 104   ;;  %s2084_s23 = smov 96   ;;  %vm680_vm10 = vcmask 130048   ;;  %vm683_vm11 = vcmask 195584  }
   0x7   :  { %v2179_v52 = vld [vmem:[%s2597_s8] sm:$0xff]  ;;  %s2085_s24 = smov 64   ;;  %s2087_s19 = smov 24  }
   0x8   :  { %v114_v53 = vperm.slane %v2179_v52, 0  ;;  %s2088_s2 = smov 16   ;;  %s1736_s15 = sshll.u32 %s2598_s9, 4  ;;  %s1737_s15 = int_to_ptr.hbm [resolvable:$true] %s1736_s15 }
   0x9   :  { %137 = vmatpush.bf16.msra.mxu0 %v1889_v23  ;;  %s2090_s16 = smov 128  }
   0xb   :  { %43 = vadd.xlane.f32.xlu0 %v42_v3  ;;  %v1961_v5 = vpop.eup %1960 }
   0xc   :  { %v46_v6 = vmul.f32 32.0, %v1961_v5  ;;  %vm50_vm1 = vweird.f32 %v1961_v5 }
   0xe   :  { %v47_v7 = vsub.f32 1.0, %v46_v6 }
  0x10   :  { %v48_v8 = vmul.f32 %v1961_v5, %v47_v7 }
  0x12   :  { %v49_v9 = vadd.f32 %v1961_v5, %v48_v8 }
  0x14   :  { %v2149_v10 = vsel %vm50_vm1, %v1961_v5, %v49_v9 }
  0x76   :  { %v41_v11 = vpop.xlane.xlu0 %40 }
  0x77   :  { %v52_v12 = vmul.f32 %v2149_v10, %v41_v11 }
  0x79   :  { %v54_v13 = vsub.f32 %v34_v0, %v52_v12 }
  0x7b   :  { %v56_v14 = vmul.f32 %v54_v13, %v54_v13 }
  0x7d   :  { %v58_v15 = vsel %vm38_vm0, %v56_v14, 0.0 }
  0x7e   :  { %59 = vadd.xlane.f32.xlu1 %v58_v15  ;;  %v44_v16 = vpop.xlane.xlu0 %43 }
  0x7f   :  { %v53_v17 = vmul.f32 %v2149_v10, %v44_v16 }
  0x81   :  { %v55_v18 = vsub.f32 %v35_v2, %v53_v17 }
  0x83   :  { %v57_v19 = vmul.f32 %v55_v18, %v55_v18 }
  0x85   :  { %v61_v20 = vsel %vm38_vm0, %v57_v19, 0.0 }
  0x86   :  { %62 = vadd.xlane.f32.xlu1 %v61_v20 }
  0xf1   :  { %v60_v22 = vpop.xlane.xlu1 %59 }
  0xf2   :  { %v64_v24 = vmul.f32 %v60_v22, %v2149_v10 }
  0xf4   :  { %v66_v25 = vadd.f32 1e-12, %v64_v24 }
  0xf6   :  { %1962 = vrsqrt.f32 %v66_v25  ;;  %vm74_vm3 = vweird.f32 %v66_v25 }
  0xf9   :  { %v63_v26 = vpop.xlane.xlu1 %62 }
  0xfa   :  { %v65_v27 = vmul.f32 %v63_v26, %v2149_v10 }
  0xfc   :  { %v1963_v28 = vpop.eup %1962  ;;  %v67_v29 = vadd.f32 1e-12, %v65_v27 }
  0xfd   :  { %v69_v30 = vmul.f32 %v1963_v28, %v66_v25  ;;  %vm75_vm2 = vweird.f32 %v1963_v28 }
  0xfe   :  { %1964 = vrsqrt.f32 %v67_v29  ;;  %vm76_vm4 = vmor %vm74_vm3, %vm75_vm2  ;;  %vm84_vm6 = vweird.f32 %v67_v29  ;;  %vm860_vm3 = vcmask 523264  }
  0xff   :  { %v70_v31 = vmul.f32 %v1963_v28, %v69_v30 }
 0x101   :  { %v71_v32 = vmul.f32 0.5, %v70_v31 }
 0x103   :  { %v72_v33 = vsub.f32 1.5, %v71_v32 }
 0x104   :  { %v1965_v34 = vpop.eup %1964 }
 0x105   :  { %v73_v35 = vmul.f32 %v1963_v28, %v72_v33  ;;  %v79_v36 = vmul.f32 %v1965_v34, %v67_v29  ;;  %vm85_vm5 = vweird.f32 %v1965_v34 }
 0x106   :  { %vm86_vm7 = vmor %vm84_vm6, %vm85_vm5 }
 0x107   :  { %v80_v37 = vmul.f32 %v1965_v34, %v79_v36  ;;  %v77_v38 = vsel %vm76_vm4, %v1963_v28, %v73_v35 }
 0x108   :  { %v88_v41 = vmul.f32 %v77_v38, %v54_v13 }
 0x109   :  { %v81_v39 = vmul.f32 0.5, %v80_v37 }
 0x10a   :  { %v93_v46 = vmul.f32 %v1950_v42, %v88_v41 }
 0x10b   :  { %v82_v40 = vsub.f32 1.5, %v81_v39 }
 0x10c   :  { %v2169_v49 = vadd.f32 %v1951_v47, %v93_v46  ;;  %v2234_v46 = vld [vmem:[%s2590_s1 + $0x1] ss:$0 sm:$0xff] }
 0x10d   :  { %v83_v43 = vmul.f32 %v1965_v34, %v82_v40 }
 0x10f   :  { %v87_v44 = vsel %vm86_vm7, %v1965_v34, %v83_v43 }
 0x110   :  { %v89_v45 = vmul.f32 %v87_v44, %v55_v18 }
 0x112   :  { %v94_v48 = vmul.f32 %v1950_v42, %v89_v45 }
 0x114   :  { %v2171_v50 = vadd.f32 %v1951_v47, %v94_v48  ;;  %v2241_v48 = vld [vmem:[%s2590_s1] ss:$0 sm:$0xff] }
 0x116   :  { %v109_v51 = vpack.c.bf16 %v2171_v50, %v2169_v49 }
 0x118   :  { %1756 = vmatmul.msk.bf16.vlgmr.msra.gmra.mxu0 %vm38_vm0, %v109_v51 }
 0x195   :  { %v139_v54 = vpop.f32.mrf.mxu0 }
 0x196   :  { %v140_v55 = vadd.f32 %v139_v54, %v114_v53 }
 0x198   :  { %158 = vrot.lane.b32.xlu1 %v140_v55, %s2081_s3  ;;  %146 = vrot.lane.b32.xlu2 %v140_v55, %s2082_s21  ;;  %v164_v61 = vpack.c.bf16 %v140_v55, %v140_v55 }
 0x19a   :  { %v197_v62 = vunpack.c.l.b16 %v164_v61 }
 0x19c   :  { %v198_v63 = vpack.c.b16 %v197_v62, %v197_v62 }
 0x19d   :  { %v141_v56 = vpop.f32.mrf.mxu0 }
 0x19e   :  { %v142_v57 = vadd.f32 %v141_v56, %v114_v53 }
 0x1a0   :  { %154 = vrot.lane.b32.xlu0 %v142_v57, %s2083_s22  ;;  %148 = vrot.lane.b32.xlu2 %v142_v57, %s2082_s21  ;;  %v165_v58 = vpack.c.bf16 %v142_v57, %v142_v57 }
 0x1a2   :  { %v222_v59 = vunpack.c.l.b16 %v165_v58 }
 0x1a4   :  { %v223_v60 = vpack.c.b16 %v222_v59, %v222_v59 }
 0x1a8   :  { %152 = vrot.lane.b32.xlu2 %v140_v55, %s2083_s22 }
 0x1b0   :  { %160 = vrot.lane.b32.xlu2 %v142_v57, %s2081_s3 }
 0x1b8   :  { %224 = vrot.lane.b32.xlu2 %v223_v60, %s2084_s23 }
 0x1c0   :  { %199 = vrot.lane.b32.xlu2 %v198_v63, %s2084_s23 }
 0x1f2   :  { %v147_v0 = vpop.permute.xlu2 %146 }
 0x1f3   :  { %v166_v1 = vpack.c.bf16 %v147_v0, %v147_v0 }
 0x1f5   :  { %v246_v2 = vunpack.c.l.b16 %v166_v1 }
 0x1f7   :  { %v247_v3 = vpack.c.b16 %v246_v2, %v246_v2 }
 0x1f9   :  { %248 = vrot.lane.b32.xlu0 %v247_v3, %s2084_s23 }
 0x1fa   :  { %v149_v4 = vpop.permute.xlu2 %148 }
 0x1fb   :  { %v167_v5 = vpack.c.bf16 %v149_v4, %v149_v4 }
 0x1fd   :  { %v270_v6 = vunpack.c.l.b16 %v167_v5 }
 0x1ff   :  { %v2191_v7 = vpack.c.b16 %v270_v6, %v270_v6  ;;  %v2263_v6 = vld [vmem:[%s2590_s1 + $0x3] ss:$0 sm:$0xff] }
 0x201   :  { %272 = vrot.lane.b32.xlu1 %v2191_v7, %s2084_s23 }
 0x202   :  { %v153_v8 = vpop.permute.xlu2 %152 }
 0x203   :  { %v168_v9 = vpack.c.bf16 %v153_v8, %v153_v8 }
 0x205   :  { %v294_v11 = vunpack.c.l.b16 %v168_v9 }
 0x207   :  { %v2195_v12 = vpack.c.b16 %v294_v11, %v294_v11 }
 0x209   :  { %296 = vrot.lane.b32.xlu1 %v2195_v12, %s2084_s23 }
 0x20a   :  { %v159_v13 = vpop.permute.xlu1 %158  ;;  %v161_v14 = vpop.permute.xlu2 %160 }
 0x20b   :  { %v170_v15 = vpack.c.bf16 %v159_v13, %v159_v13  ;;  %v171_v23 = vpack.c.bf16 %v161_v14, %v161_v14 }
 0x20d   :  { %v342_v16 = vunpack.c.l.b16 %v170_v15  ;;  %v366_v26 = vunpack.c.l.b16 %v171_v23 }
 0x20f   :  { %v2199_v17 = vpack.c.b16 %v342_v16, %v342_v16  ;;  %v2212_v28 = vpack.c.b16 %v366_v26, %v366_v26 }
 0x211   :  { %528 = vrot.lane.b32.xlu1 %v247_v3, %s2085_s24  ;;  %344 = vrot.lane.b32.xlu2 %v2199_v17, %s2084_s23 }
 0x212   :  { %v155_v18 = vpop.permute.xlu0 %154  ;;  %v225_v19 = vpop.permute.xlu2 %224 }
 0x213   :  { %v169_v20 = vpack.c.bf16 %v155_v18, %v155_v18  ;;  %v230_v21 = vsel %vm201_vm8, %v225_v19, 0 }
 0x214   :  { %239 = vmatpush.bf16.xpose.msra.mxu2 %v230_v21 }
 0x215   :  { %v318_v22 = vunpack.c.l.b16 %v169_v20 }
 0x217   :  { %v2205_v24 = vpack.c.b16 %v318_v22, %v318_v22 }
 0x219   :  { %320 = vrot.lane.b32.xlu0 %v2205_v24, %s2084_s23  ;;  %507 = vrot.lane.b32.xlu2 %v223_v60, %s2085_s24  ;;  %v2250_v60 = vld [vmem:[%s2590_s1 + $0x2] ss:$0 sm:$0xff] }
 0x21a   :  { %v200_v25 = vpop.permute.xlu2 %199 }
 0x21b   :  { %1758 = vmatmul.msk.bf16.vlgmr.msra.gmra.mxu2 %vm201_vm8, %v165_v58  ;;  %v206_v27 = vsel %vm201_vm8, %v200_v25, 0 }
 0x21c   :  { %215 = vmatpush.bf16.xpose.msra.mxu1 %v206_v27 }
 0x221   :  { %368 = vrot.lane.b32.xlu0 %v2212_v28, %s2084_s23 }
 0x223   :  { %1757 = vmatmul.msk.bf16.vlgmr.msra.gmra.mxu1 %vm201_vm8, %v164_v61 }
 0x229   :  { %485 = vrot.lane.b32.xlu0 %v198_v63, %s2085_s24 }
 0x26b   :  { %v249_v29 = vpop.permute.xlu0 %248  ;;  %v345_v30 = vpop.permute.xlu2 %344 }
 0x26c   :  { %v254_v31 = vsel %vm201_vm8, %v249_v29, 0  ;;  %v350_v32 = vsel %vm201_vm8, %v345_v30, 0 }
 0x26d   :  { %263 = vmatpush.bf16.xpose.msra.mxu3 %v254_v31 }
 0x273   :  { %v273_v33 = vpop.permute.xlu1 %272  ;;  %v508_v39 = vpop.permute.xlu2 %507 }
 0x274   :  { %1759 = vmatmul.msk.bf16.vlgmr.msra.gmra.mxu3 %vm201_vm8, %v166_v1  ;;  %v278_v34 = vsel %vm201_vm8, %v273_v33, 0  ;;  %v513_v42 = vsel %vm490_vm9, %v508_v39, 0  ;;  %v2257_v1 = vld [vmem:[%s2590_s1 + $0x4] ss:$0 sm:$0xff] }
 0x275   :  { %359 = vmatpush.bf16.xpose.msrb.mxu3 %v350_v32  ;;  %287 = vmatpush.bf16.xpose.msrb.mxu0 %v278_v34 }
 0x27b   :  { %v297_v35 = vpop.permute.xlu1 %296 }
 0x27c   :  { %1760 = vmatmul.msk.bf16.vlgmr.msrb.gmra.mxu0 %vm201_vm8, %v167_v5  ;;  %v302_v36 = vsel %vm201_vm8, %v297_v35, 0  ;;  %v2279_v35 = vld [vmem:[%s2590_s1 + $0x5] ss:$0 sm:$0xff] }
 0x27d   :  { %311 = vmatpush.bf16.xpose.msrb.mxu1 %v302_v36 }
 0x283   :  { %v529_v37 = vpop.permute.xlu1 %528 }
 0x284   :  { %v534_v38 = vsel %vm490_vm9, %v529_v37, 0  ;;  %1761 = vmatmul.msk.bf16.vlgmr.msrb.gmra.mxu1 %vm201_vm8, %v168_v9  ;;  %1763 = vmatmul.msk.bf16.vlgmr.msrb.gmra.mxu3 %vm201_vm8, %v170_v15  ;;  %v2269_v9 = vld [vmem:[%s2590_s1 + $0x6] ss:$0 sm:$0xff] }
 0x285   :  { %543 = vmatpush.bf16.msra.mxu3 %v534_v38  ;;  %v2288_v38 = vld [vmem:[%s2590_s1 + $0x7] ss:$0 sm:$0xff]  ;;  %s2086_s1 = smov 8  }
 0x28b   :  { %v321_v40 = vpop.permute.xlu0 %320 }
 0x28c   :  { %v326_v41 = vsel %vm201_vm8, %v321_v40, 0 }
 0x28d   :  { %335 = vmatpush.bf16.xpose.msrb.mxu2 %v326_v41 }
 0x293   :  { %v369_v43 = vpop.permute.xlu0 %368 }
 0x294   :  { %v374_v44 = vsel %vm201_vm8, %v369_v43, 0  ;;  %1762 = vmatmul.msk.bf16.vlgmr.msrb.gmra.mxu2 %vm201_vm8, %v169_v20 }
 0x295   :  { %522 = vmatpush.bf16.msra.mxu2 %v513_v42  ;;  %383 = vmatpush.bf16.xpose.msra.mxu0 %v374_v44 }
 0x29b   :  { %v486_v45 = vpop.permute.xlu0 %485 }
 0x29c   :  { %v492_v47 = vsel %vm490_vm9, %v486_v45, 0  ;;  %1764 = vmatmul.msk.bf16.vlgmr.msra.gmra.mxu0 %vm201_vm8, %v171_v23 }
 0x29d   :  { %501 = vmatpush.bf16.msra.mxu1 %v492_v47 }
 0x29e   :  { %v241_v51 = vpop.f32.mrf.mxu2 }
 0x29f   :  { %v242_v53 = vadd.f32 %v2234_v46, %v241_v51 }
 0x2a0   :  { %v217_v54 = vpop.f32.mrf.mxu1 }
 0x2a1   :  { %v218_v55 = vadd.f32 %v2241_v48, %v217_v54  ;;  %v392_v56 = vsel %vm201_vm8, %v242_v53, -inf }
 0x2a2   :  { %393 = vmax.xlane.f32.xlu2 %v392_v56 }
 0x2a3   :  { %v389_v57 = vsel %vm201_vm8, %v218_v55, -inf }
 0x2a4   :  { %390 = vmax.xlane.f32.xlu0 %v389_v57 }
 0x2a6   :  { %v243_v58 = vpop.f32.mrf.mxu2 }
 0x2a8   :  { %v219_v59 = vpop.f32.mrf.mxu1 }
 0x2f7   :  { %v265_v61 = vpop.f32.mrf.mxu3 }
 0x2f8   :  { %v266_v62 = vadd.f32 %v2250_v60, %v265_v61 }
 0x2f9   :  { %v289_v63 = vpop.f32.mrf.mxu0 }
 0x2fa   :  { %v395_v0 = vsel %vm201_vm8, %v266_v62, -inf  ;;  %v290_v13 = vadd.f32 %v2263_v6, %v289_v63 }
 0x2fb   :  { %396 = vmax.xlane.f32.xlu1 %v395_v0 }
 0x2fc   :  { %v398_v18 = vsel %vm201_vm8, %v290_v13, -inf }
 0x2ff   :  { %v267_v2 = vpop.f32.mrf.mxu3 }
 0x301   :  { %v291_v3 = vpop.f32.mrf.mxu0  ;;  %v313_v4 = vpop.f32.mrf.mxu1 }
 0x302   :  { %v314_v5 = vadd.f32 %v2257_v1, %v313_v4 }
 0x304   :  { %v401_v8 = vsel %vm201_vm8, %v314_v5, -inf }
 0x305   :  { %402 = vmax.xlane.f32.xlu2 %v401_v8 }
 0x307   :  { %v361_v11 = vpop.f32.mrf.mxu3 }
 0x308   :  { %v362_v14 = vadd.f32 %v2269_v9, %v361_v11 }
 0x309   :  { %v315_v15 = vpop.f32.mrf.mxu1 }
 0x30a   :  { %v407_v16 = vsel %vm201_vm8, %v362_v14, -inf }
 0x30b   :  { %408 = vmax.xlane.f32.xlu0 %v407_v16 }
 0x30d   :  { %399 = vmax.xlane.f32.xlu2 %v398_v18 }
 0x30f   :  { %v363_v19 = vpop.f32.mrf.mxu3 }
 0x315   :  { %v394_v20 = vpop.xlane.xlu2 %393 }
 0x316   :  { %v414_v21 = vsub.f32 %v242_v53, %v394_v20 }
 0x317   :  { %v337_v22 = vpop.f32.mrf.mxu2  ;;  %v391_v23 = vpop.xlane.xlu0 %390 }
 0x318   :  { %v423_v25 = vmul.f32 1.442695, %v414_v21  ;;  %v413_v26 = vsub.f32 %v218_v55, %v391_v23  ;;  %v338_v37 = vadd.f32 %v2279_v35, %v337_v22 }
 0x319   :  { %v385_v27 = vpop.f32.mrf.mxu0 }
 0x31a   :  { %1966 = vpow2.f32 %v423_v25  ;;  %v421_v29 = vmul.f32 1.442695, %v413_v26  ;;  %v404_v39 = vsel %vm201_vm8, %v338_v37, -inf  ;;  %v386_v40 = vadd.f32 %v2288_v38, %v385_v27 }
 0x31c   :  { %1968 = vpow2.f32 %v421_v29  ;;  %v410_v41 = vsel %vm201_vm8, %v386_v40, -inf }
 0x31f   :  { %v339_v30 = vpop.f32.mrf.mxu2 }
 0x320   :  { %v1967_v31 = vpop.eup %1966 }
 0x321   :  { %v387_v32 = vpop.f32.mrf.mxu0  ;;  %v440_v33 = vsel %vm201_vm8, %v1967_v31, 0.0 }
 0x322   :  { %v1969_v34 = vpop.eup %1968  ;;  %441 = vadd.xlane.f32.xlu0 %v440_v33 }
 0x323   :  { %v437_v36 = vsel %vm201_vm8, %v1969_v34, 0.0 }
 0x324   :  { %438 = vadd.xlane.f32.xlu1 %v437_v36 }
 0x325   :  { %549 = vrot.lane.b32.xlu2 %v2191_v7, %s2085_s24 }
 0x32c   :  { %405 = vmax.xlane.f32.xlu1 %v404_v39 }
 0x334   :  { %411 = vmax.xlane.f32.xlu1 %v410_v41 }
 0x34d   :  { %591 = vrot.lane.b32.xlu1 %v2205_v24, %s2085_s24 }
 0x36e   :  { %v397_v42 = vpop.xlane.xlu1 %396 }
 0x36f   :  { %v415_v44 = vsub.f32 %v266_v62, %v397_v42 }
 0x371   :  { %v425_v47 = vmul.f32 1.442695, %v415_v44 }
 0x378   :  { %v403_v7 = vpop.xlane.xlu2 %402 }
 0x379   :  { %v417_v43 = vsub.f32 %v314_v5, %v403_v7 }
 0x37b   :  { %v429_v45 = vmul.f32 1.442695, %v417_v43 }
 0x37d   :  { %1970 = vpow2.f32 %v429_v45 }
 0x37e   :  { %v409_v51 = vpop.xlane.xlu0 %408  ;;  %1972 = vpow2.f32 %v425_v47 }
 0x37f   :  { %v419_v53 = vsub.f32 %v362_v14, %v409_v51 }
 0x380   :  { %v400_v54 = vpop.xlane.xlu2 %399 }
 0x381   :  { %v433_v55 = vmul.f32 1.442695, %v419_v53  ;;  %v416_v56 = vsub.f32 %v290_v13, %v400_v54 }
 0x383   :  { %v2295_v57 = vpop.eup %1970  ;;  %1974 = vpow2.f32 %v433_v55  ;;  %v427_v58 = vmul.f32 1.442695, %v416_v56 }
 0x384   :  { %v449_v24 = vsel %vm201_vm8, %v2295_v57, 0.0  ;;  %v1973_v59 = vpop.eup %1972 }
 0x385   :  { %1976 = vpow2.f32 %v427_v58  ;;  %450 = vadd.xlane.f32.xlu2 %v449_v24  ;;  %v443_v3 = vsel %vm201_vm8, %v1973_v59, 0.0 }
 0x388   :  { %v550_v61 = vpop.permute.xlu2 %549 }
 0x389   :  { %v1975_v62 = vpop.eup %1974  ;;  %v555_v63 = vsel %vm490_vm9, %v550_v61, 0 }
 0x38a   :  { %564 = vmatpush.bf16.msrb.mxu0 %v555_v63  ;;  %v455_v0 = vsel %vm201_vm8, %v1975_v62, 0.0 }
 0x38b   :  { %v1977_v2 = vpop.eup %1976  ;;  %456 = vadd.xlane.f32.xlu1 %v455_v0 }
 0x38c   :  { %v446_v4 = vsel %vm201_vm8, %v1977_v2, 0.0 }
 0x38d   :  { %444 = vadd.xlane.f32.xlu2 %v443_v3  ;;  %447 = vadd.xlane.f32.xlu0 %v446_v4 }
 0x395   :  { %v442_v5 = vpop.xlane.xlu0 %441 }
 0x396   :  { %1978 = vrcp.f32 %v442_v5 }
 0x397   :  { %v439_v8 = vpop.xlane.xlu1 %438 }
 0x398   :  { %1980 = vrcp.f32 %v439_v8 }
 0x39c   :  { %v1979_v11 = vpop.eup %1978 }
 0x39d   :  { %v470_v13 = vmul.f32 %v1979_v11, %v1967_v31 }
 0x39e   :  { %v1981_v14 = vpop.eup %1980 }
 0x39f   :  { %v478_v15 = vpack.c.bf16 %v470_v13, %v470_v13  ;;  %v469_v16 = vmul.f32 %v1981_v14, %v1969_v34  ;;  %v406_v18 = vpop.xlane.xlu1 %405 }
 0x3a0   :  { %v418_v19 = vsub.f32 %v338_v37, %v406_v18 }
 0x3a1   :  { %v477_v20 = vpack.c.bf16 %v469_v16, %v469_v16  ;;  %1766 = vmatmul.msk.bf16.vlgmr.msra.gmra.mxu2 %vm201_vm8, %v478_v15 }
 0x3a2   :  { %v431_v21 = vmul.f32 1.442695, %v418_v19 }
 0x3a3   :  { %1765 = vmatmul.msk.bf16.vlgmr.msra.gmra.mxu1 %vm201_vm8, %v477_v20 }
 0x3a4   :  { %1982 = vpow2.f32 %v431_v21  ;;  %633 = vrot.lane.b32.xlu1 %v2212_v28, %s2085_s24 }
 0x3a5   :  { %612 = vrot.lane.b32.xlu2 %v2199_v17, %s2085_s24 }
 0x3a7   :  { %v412_v22 = vpop.xlane.xlu1 %411 }
 0x3a8   :  { %v420_v23 = vsub.f32 %v386_v40, %v412_v22 }
 0x3aa   :  { %v1983_v25 = vpop.eup %1982  ;;  %v435_v26 = vmul.f32 1.442695, %v420_v23 }
 0x3ab   :  { %v452_v27 = vsel %vm201_vm8, %v1983_v25, 0.0 }
 0x3ac   :  { %1984 = vpow2.f32 %v435_v26  ;;  %453 = vadd.xlane.f32.xlu0 %v452_v27 }
 0x3b2   :  { %v1985_v29 = vpop.eup %1984 }
 0x3b3   :  { %v458_v30 = vsel %vm201_vm8, %v1985_v29, 0.0 }
 0x3b4   :  { %459 = vadd.xlane.f32.xlu0 %v458_v30  ;;  %v1892_v30 = vld [vmem:[%s2594_s5 + $0x8] sm:$0xff] }
 0x3bf   :  { %v592_v31 = vpop.permute.xlu1 %591 }
 0x3c0   :  { %v597_v32 = vsel %vm490_vm9, %v592_v31, 0  ;;  %v1891_v31 = vld [vmem:[%s2594_s5] sm:$0xff] }
 0x3c1   :  { %606 = vmatpush.bf16.msrb.mxu2 %v597_v32 }
 0x3c8   :  { %570 = vrot.lane.b32.xlu0 %v2195_v12, %s2085_s24 }
 0x3f8   :  { %v451_v17 = vpop.xlane.xlu2 %450 }
 0x3fe   :  { %v457_v7 = vpop.xlane.xlu1 %456 }
 0x400   :  { %v448_v28 = vpop.xlane.xlu0 %447  ;;  %v445_v33 = vpop.xlane.xlu2 %444 }
 0x401   :  { %1986 = vrcp.f32 %v448_v28 }
 0x402   :  { %1988 = vrcp.f32 %v445_v33 }
 0x403   :  { %1990 = vrcp.f32 %v457_v7 }
 0x407   :  { %v1987_v34 = vpop.eup %1986 }
 0x408   :  { %v1989_v36 = vpop.eup %1988  ;;  %v472_v37 = vmul.f32 %v1987_v34, %v1977_v2  ;;  %v613_v39 = vpop.permute.xlu2 %612 }
 0x409   :  { %v471_v40 = vmul.f32 %v1989_v36, %v1973_v59  ;;  %v618_v41 = vsel %vm490_vm9, %v613_v39, 0  ;;  %v1991_v12 = vpop.eup %1990 }
 0x40a   :  { %v480_v42 = vpack.c.bf16 %v472_v37, %v472_v37  ;;  %627 = vmatpush.bf16.msrb.mxu3 %v618_v41  ;;  %v475_v45 = vmul.f32 %v1991_v12, %v1975_v62 }
 0x40b   :  { %v479_v43 = vpack.c.bf16 %v471_v40, %v471_v40 }
 0x40c   :  { %1768 = vmatmul.msk.bf16.vlgmr.msrb.gmra.mxu0 %vm201_vm8, %v480_v42  ;;  %v483_v51 = vpack.c.bf16 %v475_v45, %v475_v45 }
 0x40d   :  { %1767 = vmatmul.msk.bf16.vlgmr.msra.gmra.mxu3 %vm201_vm8, %v479_v43 }
 0x416   :  { %v634_v44 = vpop.permute.xlu1 %633 }
 0x417   :  { %v639_v47 = vsel %vm490_vm9, %v634_v44, 0 }
 0x418   :  { %648 = vmatpush.bf16.msra.mxu0 %v639_v47  ;;  %v691_v47 = vperm.slane %v2179_v52, 1 }
 0x41d   :  { %1771 = vmatmul.msk.bf16.vlgmr.msrb.gmra.mxu3 %vm201_vm8, %v483_v51 }
 0x41f   :  { %v454_v53 = vpop.xlane.xlu0 %453 }
 0x420   :  { %1992 = vrcp.f32 %v454_v53  ;;  %v503_v54 = vpop.f32.mrf.mxu1 }
 0x424   :  { %v524_v55 = vpop.f32.mrf.mxu2 }
 0x426   :  { %v1993_v56 = vpop.eup %1992 }
 0x427   :  { %v474_v58 = vmul.f32 %v1993_v56, %v1983_v25  ;;  %v460_v24 = vpop.xlane.xlu0 %459 }
 0x428   :  { %1994 = vrcp.f32 %v460_v24  ;;  %v505_v59 = vpop.f32.mrf.mxu1 }
 0x429   :  { %v482_v61 = vpack.c.bf16 %v474_v58, %v474_v58  ;;  %1996 = vrcp.f32 %v451_v17 }
 0x42b   :  { %1770 = vmatmul.msk.bf16.vlgmr.msrb.gmra.mxu2 %vm201_vm8, %v482_v61 }
 0x42c   :  { %v526_v63 = vpop.f32.mrf.mxu2 }
 0x42e   :  { %v1995_v62 = vpop.eup %1994 }
 0x42f   :  { %v476_v0 = vmul.f32 %v1995_v62, %v1985_v29  ;;  %v1997_v3 = vpop.eup %1996 }
 0x430   :  { %v473_v4 = vmul.f32 %v1997_v3, %v2295_v57 }
 0x431   :  { %v484_v2 = vpack.c.bf16 %v476_v0, %v476_v0 }
 0x432   :  { %v481_v11 = vpack.c.bf16 %v473_v4, %v473_v4 }
 0x433   :  { %1772 = vmatmul.msk.bf16.vlgmr.msra.gmra.mxu0 %vm201_vm8, %v484_v2 }
 0x43a   :  { %v571_v5 = vpop.permute.xlu0 %570 }
 0x43b   :  { %v576_v8 = vsel %vm490_vm9, %v571_v5, 0 }
 0x43c   :  { %585 = vmatpush.bf16.msrb.mxu1 %v576_v8 }
 0x43f   :  { %1769 = vmatmul.msk.bf16.vlgmr.msrb.gmra.mxu1 %vm201_vm8, %v481_v11 }
 0x440   :  { %713 = vmatpush.bf16.msra.mxu1 %v1892_v30 }
 0x444   :  { %714 = vmatpush.bf16.msra.mxu1 %v1891_v31 }
 0x489   :  { %v566_v13 = vpop.f32.mrf.mxu0 }
 0x490   :  { %v545_v14 = vpop.f32.mrf.mxu3 }
 0x491   :  { %v1920_v15 = vpack.i.bf16 %v566_v13, %v545_v14  ;;  %v568_v16 = vpop.f32.mrf.mxu0 }
 0x493   :  { %1921 = vrot.lane.b32.xlu0 %v1920_v15, %s2086_s1  ;;  %v1893_v15 = vld [vmem:[%s2595_s6] sm:$0xff] }
 0x498   :  { %v547_v18 = vpop.f32.mrf.mxu3 }
 0x4a0   :  { %v629_v19 = vpop.f32.mrf.mxu3 }
 0x4a8   :  { %v631_v20 = vpop.f32.mrf.mxu3 }
 0x4ae   :  { %v608_v21 = vpop.f32.mrf.mxu2 }
 0x4b0   :  { %v650_v22 = vpop.f32.mrf.mxu0 }
 0x4b1   :  { %v1930_v57 = vpack.i.bf16 %v650_v22, %v629_v19 }
 0x4b3   :  { %1931 = vrot.lane.b32.xlu1 %v1930_v57, %s2087_s19 }
 0x4b6   :  { %v610_v23 = vpop.f32.mrf.mxu2 }
 0x4b8   :  { %v652_v25 = vpop.f32.mrf.mxu0 }
 0x4bc   :  { %v587_v26 = vpop.f32.mrf.mxu1 }
 0x4bd   :  { %v1925_v27 = vpack.i.bf16 %v608_v21, %v587_v26 }
 0x4bf   :  { %1926 = vrot.lane.b32.xlu2 %v1925_v27, %s2088_s2 }
 0x4c4   :  { %v589_v29 = vpop.f32.mrf.mxu1 }
 0x505   :  { %v1922_v32 = vpop.permute.xlu0 %1921 }
 0x506   :  { %v1924_v28 = vunpack.i.h.bf16 %v1922_v32  ;;  %v1923_v33 = vunpack.i.l.bf16 %v1922_v32 }
 0x508   :  { %v679_v39 = vsel %vm201_vm8, %v524_v55, %v1924_v28  ;;  %v678_v40 = vsel %vm201_vm8, %v503_v54, %v1923_v33 }
 0x519   :  { %v1927_v17 = vpop.permute.xlu2 %1926 }
 0x51a   :  { %v1929_v34 = vunpack.i.h.bf16 %v1927_v17  ;;  %v1928_v36 = vunpack.i.l.bf16 %v1927_v17  ;;  %v767_v17 = vperm.slane %v2179_v52, 2 }
 0x51c   :  { %v682_v7 = vsel %vm680_vm10, %v679_v39, %v1929_v34  ;;  %v681_v43 = vsel %vm680_vm10, %v678_v40, %v1928_v36  ;;  %v770_v36 = vperm.slane %v2179_v52, 3 }
 0x525   :  { %v1932_v37 = vpop.permute.xlu1 %1931 }
 0x526   :  { %v1934_v41 = vunpack.i.h.bf16 %v1932_v37  ;;  %v1933_v42 = vunpack.i.l.bf16 %v1932_v37 }
 0x528   :  { %v684_v12 = vsel %vm683_vm11, %v681_v43, %v1933_v42  ;;  %v685_v44 = vsel %vm683_vm11, %v682_v7, %v1934_v41  ;;  %v1898_v43 = vld [vmem:[%s2596_s7 + $0x18] sm:$0xff] }
 0x529   :  { %v686_v45 = vpack.c.bf16 %v685_v44, %v684_v12  ;;  %868 = vmatpush.bf16.msra.mxu3 %v1898_v43  ;;  %v1897_v12 = vld [vmem:[%s2596_s7 + $0x10] sm:$0xff]  ;;  %v1896_v44 = vld [vmem:[%s2596_s7 + $0x8] sm:$0xff] }
 0x52b   :  { %1781 = vmatmul.msk.bf16.vlgmr.msra.gmra.mxu1 %vm38_vm0, %v686_v45  ;;  %v1895_v45 = vld [vmem:[%s2596_s7] sm:$0xff] }
 0x52d   :  { %869 = vmatpush.bf16.msra.mxu3 %v1897_v12 }
 0x531   :  { %870 = vmatpush.bf16.msra.mxu3 %v1896_v44 }
 0x535   :  { %871 = vmatpush.bf16.msra.mxu3 %v1895_v45 }
 0x5a8   :  { %v716_v51 = vpop.f32.mrf.mxu1 }
 0x5a9   :  { %v717_v53 = vadd.f32 %v716_v51, %v691_v47 }
 0x5ab   :  { %v721_v55 = vadd.f32 %v717_v53, %v2169_v49 }
 0x5ad   :  { %v723_v54 = vsel %vm38_vm0, %v721_v55, 0.0 }
 0x5ae   :  { %724 = vadd.xlane.f32.xlu0 %v723_v54 }
 0x5b0   :  { %v718_v56 = vpop.f32.mrf.mxu1 }
 0x5b1   :  { %v719_v58 = vadd.f32 %v718_v56, %v691_v47  ;;  %v778_v47 = vperm.slane %v2179_v52, 4 }
 0x5b3   :  { %v722_v24 = vadd.f32 %v719_v58, %v2171_v50  ;;  %v1894_v50 = vld [vmem:[%s2595_s6 + $0x8] sm:$0xff] }
 0x5b4   :  { %800 = vmatpush.bf16.msra.mxu2 %v1894_v50 }
 0x5b5   :  { %v726_v59 = vsel %vm38_vm0, %v722_v24, 0.0 }
 0x5b6   :  { %727 = vadd.xlane.f32.xlu2 %v726_v59 }
 0x5b8   :  { %801 = vmatpush.bf16.msra.mxu2 %v1893_v15 }
 0x621   :  { %v725_v61 = vpop.xlane.xlu0 %724 }
 0x622   :  { %v729_v63 = vmul.f32 %v725_v61, %v2149_v10 }
 0x624   :  { %v731_v62 = vsub.f32 %v721_v55, %v729_v63 }
 0x626   :  { %v733_v0 = vmul.f32 %v731_v62, %v731_v62 }
 0x628   :  { %v735_v2 = vsel %vm38_vm0, %v733_v0, 0.0 }
 0x629   :  { %v728_v3 = vpop.xlane.xlu2 %727  ;;  %736 = vadd.xlane.f32.xlu1 %v735_v2 }
 0x62a   :  { %v730_v49 = vmul.f32 %v728_v3, %v2149_v10 }
 0x62c   :  { %v732_v4 = vsub.f32 %v722_v24, %v730_v49 }
 0x62e   :  { %v734_v5 = vmul.f32 %v732_v4, %v732_v4 }
 0x630   :  { %v738_v8 = vsel %vm38_vm0, %v734_v5, 0.0 }
 0x631   :  { %739 = vadd.xlane.f32.xlu0 %v738_v8 }
 0x69c   :  { %v737_v11 = vpop.xlane.xlu1 %736 }
 0x69d   :  { %v741_v13 = vmul.f32 %v737_v11, %v2149_v10 }
 0x69f   :  { %v743_v14 = vadd.f32 1e-12, %v741_v13 }
 0x6a1   :  { %1998 = vrsqrt.f32 %v743_v14  ;;  %vm751_vm13 = vweird.f32 %v743_v14 }
 0x6a4   :  { %v740_v16 = vpop.xlane.xlu0 %739 }
 0x6a5   :  { %v742_v18 = vmul.f32 %v740_v16, %v2149_v10  ;;  %v835_v16 = vperm.slane %v2179_v52, 5 }
 0x6a7   :  { %v1999_v19 = vpop.eup %1998  ;;  %v744_v20 = vadd.f32 1e-12, %v742_v18 }
 0x6a8   :  { %v746_v21 = vmul.f32 %v1999_v19, %v743_v14  ;;  %vm752_vm12 = vweird.f32 %v1999_v19 }
 0x6a9   :  { %2000 = vrsqrt.f32 %v744_v20  ;;  %vm753_vm14 = vmor %vm751_vm13, %vm752_vm12  ;;  %vm761_vm1 = vweird.f32 %v744_v20 }
 0x6aa   :  { %v747_v22 = vmul.f32 %v1999_v19, %v746_v21 }
 0x6ac   :  { %v748_v57 = vmul.f32 0.5, %v747_v22 }
 0x6ae   :  { %v749_v23 = vsub.f32 1.5, %v748_v57 }
 0x6af   :  { %v2001_v25 = vpop.eup %2000 }
 0x6b0   :  { %v750_v26 = vmul.f32 %v1999_v19, %v749_v23  ;;  %v756_v27 = vmul.f32 %v2001_v25, %v744_v20  ;;  %vm762_vm15 = vweird.f32 %v2001_v25 }
 0x6b1   :  { %vm763_vm2 = vmor %vm761_vm1, %vm762_vm15 }
 0x6b2   :  { %v757_v29 = vmul.f32 %v2001_v25, %v756_v27  ;;  %v754_v30 = vsel %vm753_vm14, %v1999_v19, %v750_v26 }
 0x6b3   :  { %v765_v28 = vmul.f32 %v754_v30, %v731_v62 }
 0x6b4   :  { %v758_v31 = vmul.f32 0.5, %v757_v29 }
 0x6b5   :  { %v768_v37 = vmul.f32 %v767_v17, %v765_v28 }
 0x6b6   :  { %v759_v32 = vsub.f32 1.5, %v758_v31 }
 0x6b7   :  { %v771_v41 = vadd.f32 %v770_v36, %v768_v37 }
 0x6b8   :  { %v760_v33 = vmul.f32 %v2001_v25, %v759_v32 }
 0x6ba   :  { %v764_v34 = vsel %vm763_vm2, %v2001_v25, %v760_v33 }
 0x6bb   :  { %v766_v39 = vmul.f32 %v764_v34, %v732_v4 }
 0x6bd   :  { %v769_v40 = vmul.f32 %v767_v17, %v766_v39 }
 0x6bf   :  { %v772_v42 = vadd.f32 %v770_v36, %v769_v40  ;;  %v1900_v36 = vld [vmem:[%s2593_s4 + $0x18] sm:$0xff] }
 0x6c0   :  { %960 = vmatpush.bf16.msrb.mxu0 %v1900_v36 }
 0x6c1   :  { %v773_v7 = vpack.c.bf16 %v772_v42, %v771_v41 }
 0x6c3   :  { %1790 = vmatmul.msk.bf16.vlgmr.msra.gmra.mxu2 %vm38_vm0, %v773_v7 }
 0x746   :  { %v803_v51 = vpop.f32.mrf.mxu2 }
 0x747   :  { %v804_v53 = vadd.f32 %v803_v51, %v778_v47 }
 0x749   :  { %v810_v55 = vmul.f32 0.044715, %v804_v53  ;;  %v808_v8 = vmul.f32 0.5, %v804_v53 }
 0x74b   :  { %v812_v54 = vmul.f32 %v810_v55, %v804_v53 }
 0x74d   :  { %v814_v56 = vmul.f32 %v812_v54, %v804_v53 }
 0x74e   :  { %v805_v58 = vpop.f32.mrf.mxu2 }
 0x74f   :  { %v816_v24 = vadd.f32 %v814_v56, %v804_v53  ;;  %v806_v59 = vadd.f32 %v805_v58, %v778_v47 }
 0x751   :  { %v811_v61 = vmul.f32 0.044715, %v806_v59  ;;  %v818_v63 = vmul.f32 0.7978846, %v816_v24  ;;  %v809_v50 = vmul.f32 0.5, %v806_v59 }
 0x753   :  { %v813_v62 = vmul.f32 %v811_v61, %v806_v59  ;;  %2002 = vtanh.f32 %v818_v63  ;;  %v924_v61 = vperm.slane %v2179_v52, 6 }
 0x755   :  { %v815_v0 = vmul.f32 %v813_v62, %v806_v59 }
 0x757   :  { %v817_v2 = vadd.f32 %v815_v0, %v806_v59 }
 0x759   :  { %v819_v3 = vmul.f32 0.7978846, %v817_v2  ;;  %v2003_v49 = vpop.eup %2002  ;;  %v927_v2 = vperm.slane %v2179_v52, 7 }
 0x75a   :  { %v822_v4 = vadd.f32 1.0, %v2003_v49 }
 0x75b   :  { %2004 = vtanh.f32 %v819_v3 }
 0x75c   :  { %v824_v13 = vmul.f32 %v822_v4, %v808_v8 }
 0x761   :  { %v2005_v5 = vpop.eup %2004 }
 0x762   :  { %v823_v11 = vadd.f32 1.0, %v2005_v5 }
 0x764   :  { %v825_v14 = vmul.f32 %v823_v11, %v809_v50  ;;  %v2401_v11 = vld [vmem:[%s2597_s8 + $0x8] sm:$0xff] }
 0x766   :  { %v826_v15 = vpack.c.bf16 %v825_v14, %v824_v13  ;;  %v938_v13 = vperm.slane %v2401_v11, 0 }
 0x768   :  { %1807 = vmatmul.msk.bf16.vlgmr.msra.gmra.mxu3 %vm860_vm3, %v826_v15 }
 0x7eb   :  { %v873_v18 = vpop.f32.mrf.mxu3 }
 0x7ec   :  { %v874_v19 = vadd.f32 %v873_v18, %v835_v16 }
 0x7ee   :  { %v878_v20 = vadd.f32 %v874_v19, %v771_v41  ;;  %v1899_v41 = vld [vmem:[%s2593_s4 + $0x10] sm:$0xff] }
 0x7ef   :  { %961 = vmatpush.bf16.msrb.mxu0 %v1899_v41 }
 0x7f0   :  { %v880_v21 = vsel %vm38_vm0, %v878_v20, 0.0 }
 0x7f1   :  { %881 = vadd.xlane.f32.xlu2 %v880_v21 }
 0x7f3   :  { %v875_v22 = vpop.f32.mrf.mxu3 }
 0x7f4   :  { %v876_v57 = vadd.f32 %v875_v22, %v835_v16 }
 0x7f6   :  { %v879_v23 = vadd.f32 %v876_v57, %v772_v42 }
 0x7f8   :  { %v883_v25 = vsel %vm38_vm0, %v879_v23, 0.0 }
 0x7f9   :  { %884 = vadd.xlane.f32.xlu1 %v883_v25 }
 0x864   :  { %v882_v26 = vpop.xlane.xlu2 %881 }
 0x865   :  { %v886_v27 = vmul.f32 %v882_v26, %v2149_v10 }
 0x867   :  { %v888_v29 = vsub.f32 %v878_v20, %v886_v27 }
 0x869   :  { %v890_v30 = vmul.f32 %v888_v29, %v888_v29 }
 0x86b   :  { %v892_v31 = vsel %vm38_vm0, %v890_v30, 0.0 }
 0x86c   :  { %v885_v32 = vpop.xlane.xlu1 %884  ;;  %893 = vadd.xlane.f32.xlu0 %v892_v31 }
 0x86d   :  { %v887_v17 = vmul.f32 %v885_v32, %v2149_v10 }
 0x86f   :  { %v889_v28 = vsub.f32 %v879_v23, %v887_v17 }
 0x871   :  { %v891_v33 = vmul.f32 %v889_v28, %v889_v28 }
 0x873   :  { %v895_v34 = vsel %vm38_vm0, %v891_v33, 0.0 }
 0x874   :  { %896 = vadd.xlane.f32.xlu2 %v895_v34 }
 0x8df   :  { %v894_v37 = vpop.xlane.xlu0 %893 }
 0x8e0   :  { %v898_v39 = vmul.f32 %v894_v37, %v2149_v10 }
 0x8e2   :  { %v900_v40 = vadd.f32 1e-12, %v898_v39 }
 0x8e4   :  { %2006 = vrsqrt.f32 %v900_v40  ;;  %vm908_vm5 = vweird.f32 %v900_v40 }
 0x8e7   :  { %v897_v42 = vpop.xlane.xlu2 %896 }
 0x8e8   :  { %v899_v7 = vmul.f32 %v897_v42, %v2149_v10 }
 0x8ea   :  { %v2007_v43 = vpop.eup %2006  ;;  %v901_v12 = vadd.f32 1e-12, %v899_v7 }
 0x8eb   :  { %v903_v44 = vmul.f32 %v2007_v43, %v900_v40  ;;  %vm909_vm4 = vweird.f32 %v2007_v43 }
 0x8ec   :  { %2008 = vrsqrt.f32 %v901_v12  ;;  %vm910_vm6 = vmor %vm908_vm5, %vm909_vm4  ;;  %vm918_vm12 = vweird.f32 %v901_v12 }
 0x8ed   :  { %v904_v45 = vmul.f32 %v2007_v43, %v903_v44 }
 0x8ef   :  { %v905_v47 = vmul.f32 0.5, %v904_v45 }
 0x8f1   :  { %v906_v51 = vsub.f32 1.5, %v905_v47 }
 0x8f2   :  { %v2009_v53 = vpop.eup %2008 }
 0x8f3   :  { %v907_v55 = vmul.f32 %v2007_v43, %v906_v51  ;;  %v913_v54 = vmul.f32 %v2009_v53, %v901_v12  ;;  %vm919_vm7 = vweird.f32 %v2009_v53 }
 0x8f4   :  { %vm920_vm13 = vmor %vm918_vm12, %vm919_vm7 }
 0x8f5   :  { %v914_v56 = vmul.f32 %v2009_v53, %v913_v54  ;;  %v911_v58 = vsel %vm910_vm6, %v2007_v43, %v907_v55 }
 0x8f6   :  { %v922_v63 = vmul.f32 %v911_v58, %v888_v29 }
 0x8f7   :  { %v915_v24 = vmul.f32 0.5, %v914_v56 }
 0x8f8   :  { %v925_v3 = vmul.f32 %v924_v61, %v922_v63 }
 0x8f9   :  { %v916_v59 = vsub.f32 1.5, %v915_v24 }
 0x8fa   :  { %v2391_v5 = vadd.f32 %v927_v2, %v925_v3 }
 0x8fb   :  { %v917_v62 = vmul.f32 %v2009_v53, %v916_v59 }
 0x8fd   :  { %v921_v0 = vsel %vm920_vm13, %v2009_v53, %v917_v62 }
 0x8fe   :  { %v923_v49 = vmul.f32 %v921_v0, %v889_v28 }
 0x900   :  { %v926_v4 = vmul.f32 %v924_v61, %v923_v49 }
 0x902   :  { %v2393_v8 = vadd.f32 %v927_v2, %v926_v4 }
 0x904   :  { %v932_v50 = vpack.c.bf16 %v2393_v8, %v2391_v5 }
 0x906   :  { %1821 = vmatmul.msk.bf16.vlgmr.msrb.gmra.mxu0 %vm38_vm0, %v932_v50 }
 0x983   :  { %v963_v52 = vpop.f32.mrf.mxu0 }
 0x984   :  { %v964_v14 = vadd.f32 %v963_v52, %v938_v13 }
 0x986   :  { %970 = vrot.lane.b32.xlu1 %v964_v14, %s2082_s21  ;;  %v988_v19 = vpack.c.bf16 %v964_v14, %v964_v14 }
 0x988   :  { %v997_v21 = vunpack.c.l.b16 %v988_v19 }
 0x98a   :  { %v2412_v57 = vpack.c.b16 %v997_v21, %v997_v21 }
 0x98b   :  { %v965_v15 = vpop.f32.mrf.mxu0 }
 0x98c   :  { %v966_v16 = vadd.f32 %v965_v15, %v938_v13 }
 0x98e   :  { %978 = vrot.lane.b32.xlu2 %v966_v16, %s2083_s22  ;;  %972 = vrot.lane.b32.xlu0 %v966_v16, %s2082_s21  ;;  %v989_v18 = vpack.c.bf16 %v966_v16, %v966_v16 }
 0x98f   :  { %976 = vrot.lane.b32.xlu1 %v964_v14, %s2083_s22 }
 0x990   :  { %v1021_v20 = vunpack.c.l.b16 %v989_v18 }
 0x992   :  { %v2410_v22 = vpack.c.b16 %v1021_v20, %v1021_v20 }
 0x996   :  { %984 = vrot.lane.b32.xlu2 %v966_v16, %s2081_s3  ;;  %982 = vrot.lane.b32.xlu0 %v964_v14, %s2081_s3 }
 0x99e   :  { %1023 = vrot.lane.b32.xlu0 %v2410_v22, %s2084_s23  ;;  %999 = vrot.lane.b32.xlu2 %v2412_v57, %s2084_s23 }
 0x9e8   :  { %v979_v23 = vpop.permute.xlu2 %978 }
 0x9e9   :  { %v993_v32 = vpack.c.bf16 %v979_v23, %v979_v23 }
 0x9eb   :  { %v1117_v33 = vunpack.c.l.b16 %v993_v32 }
 0x9ed   :  { %v2424_v39 = vpack.c.b16 %v1117_v33, %v1117_v33 }
 0x9f0   :  { %v985_v25 = vpop.permute.xlu2 %984 }
 0x9f1   :  { %v995_v40 = vpack.c.bf16 %v985_v25, %v985_v25 }
 0x9f3   :  { %v1165_v43 = vunpack.c.l.b16 %v995_v40 }
 0x9f5   :  { %v2432_v47 = vpack.c.b16 %v1165_v43, %v1165_v43 }
 0x9f8   :  { %v971_v26 = vpop.permute.xlu1 %970  ;;  %v1000_v27 = vpop.permute.xlu2 %999 }
 0x9f9   :  { %v990_v29 = vpack.c.bf16 %v971_v26, %v971_v26  ;;  %v1005_v30 = vsel %vm201_vm8, %v1000_v27, 0 }
 0x9fa   :  { %1014 = vmatpush.bf16.xpose.msrb.mxu1 %v1005_v30 }
 0x9fb   :  { %v1045_v31 = vunpack.c.l.b16 %v990_v29 }
 0x9fd   :  { %v2419_v17 = vpack.c.b16 %v1045_v31, %v1045_v31 }
 0x9ff   :  { %1047 = vrot.lane.b32.xlu1 %v2419_v17, %s2084_s23 }
 0xa00   :  { %v973_v28 = vpop.permute.xlu0 %972 }
 0xa01   :  { %v991_v34 = vpack.c.bf16 %v973_v28, %v973_v28  ;;  %1822 = vmatmul.msk.bf16.vlgmr.msrb.gmra.mxu1 %vm201_vm8, %v988_v19  ;;  %v977_v36 = vpop.permute.xlu1 %976 }
 0xa02   :  { %v992_v42 = vpack.c.bf16 %v977_v36, %v977_v36 }
 0xa03   :  { %v1069_v37 = vunpack.c.l.b16 %v991_v34 }
 0xa04   :  { %v1093_v12 = vunpack.c.l.b16 %v992_v42 }
 0xa05   :  { %v2426_v41 = vpack.c.b16 %v1069_v37, %v1069_v37 }
 0xa06   :  { %v2434_v51 = vpack.c.b16 %v1093_v12, %v1093_v12 }
 0xa07   :  { %1071 = vrot.lane.b32.xlu0 %v2426_v41, %s2084_s23  ;;  %1119 = vrot.lane.b32.xlu1 %v2424_v39, %s2084_s23 }
 0xa08   :  { %v983_v7 = vpop.permute.xlu0 %982 }
 0xa09   :  { %v994_v44 = vpack.c.bf16 %v983_v7, %v983_v7 }
 0xa0b   :  { %v1141_v45 = vunpack.c.l.b16 %v994_v44 }
 0xa0d   :  { %v2436_v53 = vpack.c.b16 %v1141_v45, %v1141_v45 }
 0xa0f   :  { %1167 = vrot.lane.b32.xlu1 %v2432_v47, %s2084_s23  ;;  %1095 = vrot.lane.b32.xlu0 %v2434_v51, %s2084_s23 }
 0xa10   :  { %1143 = vrot.lane.b32.xlu2 %v2436_v53, %s2084_s23  ;;  %v1024_v55 = vpop.permute.xlu0 %1023 }
 0xa11   :  { %v1029_v54 = vsel %vm201_vm8, %v1024_v55, 0 }
 0xa12   :  { %1038 = vmatpush.bf16.xpose.msrb.mxu2 %v1029_v54 }
 0xa19   :  { %1823 = vmatmul.msk.bf16.vlgmr.msrb.gmra.mxu2 %vm201_vm8, %v989_v18 }
 0xa6a   :  { %v1144_v56 = vpop.permute.xlu2 %1143 }
 0xa6b   :  { %v1149_v59 = vsel %vm201_vm8, %v1144_v56, 0 }
 0xa71   :  { %v1048_v58 = vpop.permute.xlu1 %1047 }
 0xa72   :  { %v1053_v24 = vsel %vm201_vm8, %v1048_v58, 0 }
 0xa73   :  { %1062 = vmatpush.bf16.xpose.msrb.mxu3 %v1053_v24 }
 0xa79   :  { %v1072_v61 = vpop.permute.xlu0 %1071  ;;  %v1120_v63 = vpop.permute.xlu1 %1119 }
 0xa7a   :  { %v1077_v62 = vsel %vm201_vm8, %v1072_v61, 0  ;;  %v1125_v0 = vsel %vm201_vm8, %v1120_v63, 0  ;;  %1824 = vmatmul.msk.bf16.vlgmr.msrb.gmra.mxu3 %vm201_vm8, %v990_v29 }
 0xa7b   :  { %1158 = vmatpush.bf16.xpose.msra.mxu3 %v1149_v59  ;;  %1086 = vmatpush.bf16.xpose.msra.mxu0 %v1077_v62 }
 0xa7c   :  { %1134 = vmatpush.bf16.xpose.msra.mxu2 %v1125_v0 }
 0xa7e   :  { %v1016_v2 = vpop.f32.mrf.mxu1 }
 0xa7f   :  { %v1017_v3 = vadd.f32 %v2241_v48, %v1016_v2 }
 0xa81   :  { %v1096_v49 = vpop.permute.xlu0 %1095  ;;  %v1168_v4 = vpop.permute.xlu1 %1167  ;;  %v1188_v50 = vsel %vm201_vm8, %v1017_v3, -inf }
 0xa82   :  { %v1101_v13 = vsel %vm201_vm8, %v1096_v49, 0  ;;  %v1173_v52 = vsel %vm201_vm8, %v1168_v4, 0  ;;  %1825 = vmatmul.msk.bf16.vlgmr.msra.gmra.mxu0 %vm201_vm8, %v991_v34  ;;  %1189 = vmax.xlane.f32.xlu1 %v1188_v50 }
 0xa83   :  { %1827 = vmatmul.msk.bf16.vlgmr.msra.gmra.mxu2 %vm201_vm8, %v993_v32  ;;  %1110 = vmatpush.bf16.xpose.msra.mxu1 %v1101_v13 }
 0xa84   :  { %1182 = vmatpush.bf16.xpose.msrb.mxu0 %v1173_v52 }
 0xa86   :  { %v1018_v14 = vpop.f32.mrf.mxu1 }
 0xa8a   :  { %1826 = vmatmul.msk.bf16.vlgmr.msra.gmra.mxu1 %vm201_vm8, %v992_v42  ;;  %1828 = vmatmul.msk.bf16.vlgmr.msra.gmra.mxu3 %vm201_vm8, %v994_v44 }
 0xa92   :  { %1829 = vmatmul.msk.bf16.vlgmr.msrb.gmra.mxu0 %vm201_vm8, %v995_v40 }
 0xa9b   :  { %1284 = vrot.lane.b32.xlu1 %v2412_v57, %s2085_s24 }
 0xa9c   :  { %v1040_v48 = vpop.f32.mrf.mxu2 }
 0xa9d   :  { %v1041_v15 = vadd.f32 %v2234_v46, %v1040_v48 }
 0xa9f   :  { %v1191_v16 = vsel %vm201_vm8, %v1041_v15, -inf }
 0xaa0   :  { %1192 = vmax.xlane.f32.xlu2 %v1191_v16 }
 0xaa4   :  { %v1042_v18 = vpop.f32.mrf.mxu2 }
 0xaf5   :  { %v1190_v27 = vpop.xlane.xlu1 %1189 }
 0xaf6   :  { %v1212_v45 = vsub.f32 %v1017_v3, %v1190_v27 }
 0xaf8   :  { %v1220_v55 = vmul.f32 1.442695, %v1212_v45 }
 0xafd   :  { %v1064_v19 = vpop.f32.mrf.mxu3 }
 0xafe   :  { %v1065_v20 = vadd.f32 %v2250_v60, %v1064_v19 }
 0xaff   :  { %v1088_v21 = vpop.f32.mrf.mxu0 }
 0xb00   :  { %v1194_v23 = vsel %vm201_vm8, %v1065_v20, -inf  ;;  %v1089_v28 = vadd.f32 %v2263_v6, %v1088_v21 }
 0xb01   :  { %1195 = vmax.xlane.f32.xlu0 %v1194_v23 }
 0xb05   :  { %v1066_v25 = vpop.f32.mrf.mxu3 }
 0xb06   :  { %v1136_v26 = vpop.f32.mrf.mxu2 }
 0xb07   :  { %v1090_v29 = vpop.f32.mrf.mxu0  ;;  %v1112_v30 = vpop.f32.mrf.mxu1 }
 0xb08   :  { %v1113_v57 = vadd.f32 %v2257_v1, %v1112_v30  ;;  %v1197_v1 = vsel %vm201_vm8, %v1089_v28, -inf }
 0xb0a   :  { %v1200_v46 = vsel %vm201_vm8, %v1113_v57, -inf }
 0xb0b   :  { %1201 = vmax.xlane.f32.xlu2 %v1200_v46 }
 0xb0d   :  { %v1160_v32 = vpop.f32.mrf.mxu3  ;;  %v1285_v33 = vpop.permute.xlu1 %1284 }
 0xb0e   :  { %v1138_v31 = vpop.f32.mrf.mxu2  ;;  %v1161_v60 = vadd.f32 %v2269_v9, %v1160_v32  ;;  %v1290_v34 = vsel %vm490_vm9, %v1285_v33, 0 }
 0xb0f   :  { %v1114_v36 = vpop.f32.mrf.mxu1  ;;  %v1184_v37 = vpop.f32.mrf.mxu0  ;;  %1299 = vmatpush.bf16.msrb.mxu1 %v1290_v34 }
 0xb10   :  { %v1206_v40 = vsel %vm201_vm8, %v1161_v60, -inf  ;;  %v1185_v24 = vadd.f32 %v2288_v38, %v1184_v37 }
 0xb11   :  { %1207 = vmax.xlane.f32.xlu1 %v1206_v40 }
 0xb12   :  { %v1209_v59 = vsel %vm201_vm8, %v1185_v24, -inf }
 0xb13   :  { %1198 = vmax.xlane.f32.xlu2 %v1197_v1  ;;  %v1193_v42 = vpop.xlane.xlu2 %1192 }
 0xb14   :  { %v1213_v7 = vsub.f32 %v1041_v15, %v1193_v42 }
 0xb15   :  { %1326 = vrot.lane.b32.xlu0 %v2419_v17, %s2085_s24  ;;  %v1162_v6 = vpop.f32.mrf.mxu3  ;;  %v1137_v17 = vadd.f32 %v2279_v35, %v1136_v26 }
 0xb16   :  { %v1222_v43 = vmul.f32 1.442695, %v1213_v7 }
 0xb17   :  { %v1186_v12 = vpop.f32.mrf.mxu0  ;;  %v1203_v58 = vsel %vm201_vm8, %v1137_v17, -inf }
 0xb18   :  { %2010 = vpow2.f32 %v1222_v43 }
 0xb19   :  { %2012 = vpow2.f32 %v1220_v55 }
 0xb1e   :  { %v2011_v9 = vpop.eup %2010 }
 0xb1f   :  { %v1239_v44 = vsel %vm201_vm8, %v2011_v9, 0.0  ;;  %v2013_v54 = vpop.eup %2012 }
 0xb20   :  { %1240 = vadd.xlane.f32.xlu1 %v1239_v44  ;;  %v1236_v56 = vsel %vm201_vm8, %v2013_v54, 0.0 }
 0xb2b   :  { %1305 = vrot.lane.b32.xlu2 %v2410_v22, %s2085_s24 }
 0xb3f   :  { %1237 = vadd.xlane.f32.xlu0 %v1236_v56 }
 0xb47   :  { %1204 = vmax.xlane.f32.xlu0 %v1203_v58 }
 0xb4f   :  { %1210 = vmax.xlane.f32.xlu0 %v1209_v59 }
 0xb63   :  { %1347 = vrot.lane.b32.xlu0 %v2426_v41, %s2085_s24 }
 0xb74   :  { %v1196_v22 = vpop.xlane.xlu0 %1195 }
 0xb75   :  { %v1214_v61 = vsub.f32 %v1065_v20, %v1196_v22 }
 0xb77   :  { %v1224_v63 = vmul.f32 1.442695, %v1214_v61 }
 0xb79   :  { %2014 = vpow2.f32 %v1224_v63 }
 0xb7e   :  { %v1202_v62 = vpop.xlane.xlu2 %1201 }
 0xb7f   :  { %v2485_v0 = vpop.eup %2014  ;;  %v1216_v2 = vsub.f32 %v1113_v57, %v1202_v62 }
 0xb80   :  { %v1242_v35 = vsel %vm201_vm8, %v2485_v0, 0.0 }
 0xb81   :  { %v1228_v3 = vmul.f32 1.442695, %v1216_v2  ;;  %1243 = vadd.xlane.f32.xlu2 %v1242_v35 }
 0xb83   :  { %2016 = vpow2.f32 %v1228_v3 }
 0xb84   :  { %v1208_v38 = vpop.xlane.xlu1 %1207 }
 0xb85   :  { %v1218_v49 = vsub.f32 %v1161_v60, %v1208_v38 }
 0xb86   :  { %v1199_v4 = vpop.xlane.xlu2 %1198 }
 0xb87   :  { %v1232_v50 = vmul.f32 1.442695, %v1218_v49  ;;  %v1215_v13 = vsub.f32 %v1089_v28, %v1199_v4  ;;  %v1327_v41 = vpop.permute.xlu0 %1326 }
 0xb88   :  { %v1332_v52 = vsel %vm490_vm9, %v1327_v41, 0 }
 0xb89   :  { %v2490_v14 = vpop.eup %2016  ;;  %2018 = vpow2.f32 %v1232_v50  ;;  %v1226_v48 = vmul.f32 1.442695, %v1215_v13  ;;  %1341 = vmatpush.bf16.msrb.mxu3 %v1332_v52 }
 0xb8a   :  { %v1248_v15 = vsel %vm201_vm8, %v2490_v14, 0.0 }
 0xb8b   :  { %2020 = vpow2.f32 %v1226_v48  ;;  %1249 = vadd.xlane.f32.xlu1 %v1248_v15 }
 0xb8e   :  { %v1306_v16 = vpop.permute.xlu2 %1305 }
 0xb8f   :  { %v2019_v18 = vpop.eup %2018  ;;  %v1311_v19 = vsel %vm490_vm9, %v1306_v16, 0 }
 0xb90   :  { %1320 = vmatpush.bf16.msrb.mxu2 %v1311_v19  ;;  %v1254_v20 = vsel %vm201_vm8, %v2019_v18, 0.0 }
 0xb91   :  { %v2021_v21 = vpop.eup %2020  ;;  %1255 = vadd.xlane.f32.xlu0 %v1254_v20 }
 0xb92   :  { %v1245_v23 = vsel %vm201_vm8, %v2021_v21, 0.0 }
 0xb93   :  { %v1241_v25 = vpop.xlane.xlu1 %1240  ;;  %1246 = vadd.xlane.f32.xlu1 %v1245_v23 }
 0xb94   :  { %2022 = vrcp.f32 %v1241_v25 }
 0xb9a   :  { %v2023_v26 = vpop.eup %2022 }
 0xb9b   :  { %v1269_v27 = vmul.f32 %v2023_v26, %v2011_v9 }
 0xb9d   :  { %v1277_v29 = vpack.c.bf16 %v1269_v27, %v1269_v27 }
 0xb9f   :  { %1831 = vmatmul.msk.bf16.vlgmr.msrb.gmra.mxu2 %vm201_vm8, %v1277_v29 }
 0xba5   :  { %1410 = vrot.lane.b32.xlu0 %v2436_v53, %s2085_s24 }
 0xbac   :  { %1368 = vrot.lane.b32.xlu1 %v2434_v51, %s2085_s24 }
 0xbad   :  { %1431 = vrot.lane.b32.xlu0 %v2432_v47, %s2085_s24 }
 0xbb2   :  { %v1238_v30 = vpop.xlane.xlu0 %1237 }
 0xbb3   :  { %2024 = vrcp.f32 %v1238_v30 }
 0xbb9   :  { %v2025_v57 = vpop.eup %2024 }
 0xbba   :  { %v1268_v46 = vmul.f32 %v2025_v57, %v2013_v54  ;;  %v1205_v31 = vpop.xlane.xlu0 %1204 }
 0xbbb   :  { %v1217_v32 = vsub.f32 %v1137_v17, %v1205_v31 }
 0xbbc   :  { %v1276_v28 = vpack.c.bf16 %v1268_v46, %v1268_v46 }
 0xbbd   :  { %v1230_v33 = vmul.f32 1.442695, %v1217_v32 }
 0xbbe   :  { %1830 = vmatmul.msk.bf16.vlgmr.msrb.gmra.mxu1 %vm201_vm8, %v1276_v28 }
 0xbbf   :  { %2026 = vpow2.f32 %v1230_v33 }
 0xbc2   :  { %v1211_v60 = vpop.xlane.xlu0 %1210 }
 0xbc3   :  { %v1219_v34 = vsub.f32 %v1185_v24, %v1211_v60  ;;  %v1902_v60 = vld [vmem:[%s2594_s5 + $0x18] sm:$0xff] }
 0xbc5   :  { %v2027_v53 = vpop.eup %2026  ;;  %v1234_v36 = vmul.f32 1.442695, %v1219_v34  ;;  %v1901_v34 = vld [vmem:[%s2594_s5 + $0x10] sm:$0xff] }
 0xbc6   :  { %v1251_v51 = vsel %vm201_vm8, %v2027_v53, 0.0 }
 0xbc7   :  { %2028 = vpow2.f32 %v1234_v36  ;;  %1252 = vadd.xlane.f32.xlu2 %v1251_v51 }
 0xbcd   :  { %v2029_v47 = vpop.eup %2028 }
 0xbce   :  { %v1257_v37 = vsel %vm201_vm8, %v2029_v47, 0.0 }
 0xbcf   :  { %1258 = vadd.xlane.f32.xlu2 %v1257_v37 }
 0xbd5   :  { %v1348_v40 = vpop.permute.xlu0 %1347 }
 0xbd6   :  { %v1353_v1 = vsel %vm490_vm9, %v1348_v40, 0 }
 0xbd7   :  { %1362 = vmatpush.bf16.msra.mxu0 %v1353_v1 }
 0xbe7   :  { %1389 = vrot.lane.b32.xlu2 %v2424_v39, %s2085_s24 }
 0xbf4   :  { %v1244_v42 = vpop.xlane.xlu2 %1243 }
 0xbf5   :  { %2030 = vrcp.f32 %v1244_v42 }
 0xbfb   :  { %v2031_v7 = vpop.eup %2030 }
 0xbfc   :  { %v1270_v6 = vmul.f32 %v2031_v7, %v2485_v0 }
 0xbfe   :  { %v1278_v43 = vpack.c.bf16 %v1270_v6, %v1270_v6  ;;  %v1250_v12 = vpop.xlane.xlu1 %1249 }
 0xc00   :  { %1832 = vmatmul.msk.bf16.vlgmr.msrb.gmra.mxu3 %vm201_vm8, %v1278_v43 }
 0xc04   :  { %v1256_v44 = vpop.xlane.xlu0 %1255 }
 0xc06   :  { %v1247_v9 = vpop.xlane.xlu1 %1246 }
 0xc07   :  { %2032 = vrcp.f32 %v1247_v9 }
 0xc08   :  { %2034 = vrcp.f32 %v1256_v44 }
 0xc09   :  { %2036 = vrcp.f32 %v1250_v12 }
 0xc0d   :  { %v2033_v45 = vpop.eup %2032 }
 0xc0e   :  { %v1271_v55 = vmul.f32 %v2033_v45, %v2021_v21  ;;  %v2035_v56 = vpop.eup %2034 }
 0xc0f   :  { %v1274_v39 = vmul.f32 %v2035_v56, %v2019_v18  ;;  %v2037_v24 = vpop.eup %2036 }
 0xc10   :  { %v1279_v54 = vpack.c.bf16 %v1271_v55, %v1271_v55  ;;  %v1272_v22 = vmul.f32 %v2037_v24, %v2490_v14 }
 0xc11   :  { %v1282_v59 = vpack.c.bf16 %v1274_v39, %v1274_v39 }
 0xc12   :  { %1833 = vmatmul.msk.bf16.vlgmr.msra.gmra.mxu0 %vm201_vm8, %v1279_v54  ;;  %v1280_v2 = vpack.c.bf16 %v1272_v22, %v1272_v22  ;;  %v1488_v54 = vperm.slane %v2401_v11, 1 }
 0xc17   :  { %v1411_v17 = vpop.permute.xlu0 %1410 }
 0xc18   :  { %v1416_v58 = vsel %vm490_vm9, %v1411_v17, 0 }
 0xc19   :  { %1425 = vmatpush.bf16.msra.mxu3 %v1416_v58 }
 0xc1c   :  { %1836 = vmatmul.msk.bf16.vlgmr.msra.gmra.mxu3 %vm201_vm8, %v1282_v59 }
 0xc1e   :  { %v1369_v61 = vpop.permute.xlu1 %1368 }
 0xc1f   :  { %v1374_v63 = vsel %vm490_vm9, %v1369_v61, 0  ;;  %v1432_v62 = vpop.permute.xlu0 %1431 }
 0xc20   :  { %v1437_v0 = vsel %vm490_vm9, %v1432_v62, 0  ;;  %1383 = vmatpush.bf16.msra.mxu1 %v1374_v63 }
 0xc21   :  { %1446 = vmatpush.bf16.msrb.mxu0 %v1437_v0 }
 0xc22   :  { %v1322_v35 = vpop.f32.mrf.mxu2 }
 0xc23   :  { %1834 = vmatmul.msk.bf16.vlgmr.msra.gmra.mxu1 %vm201_vm8, %v1280_v2 }
 0xc24   :  { %1510 = vmatpush.bf16.msrb.mxu1 %v1902_v60 }
 0xc28   :  { %1511 = vmatpush.bf16.msrb.mxu1 %v1901_v34 }
 0xc2a   :  { %v1324_v3 = vpop.f32.mrf.mxu2 }
 0xc3a   :  { %v1253_v38 = vpop.xlane.xlu2 %1252 }
 0xc3b   :  { %v1301_v49 = vpop.f32.mrf.mxu1  ;;  %2038 = vrcp.f32 %v1253_v38 }
 0xc41   :  { %v2039_v13 = vpop.eup %2038 }
 0xc42   :  { %v1259_v4 = vpop.xlane.xlu2 %1258  ;;  %v1273_v52 = vmul.f32 %v2039_v13, %v2027_v53 }
 0xc43   :  { %2040 = vrcp.f32 %v1259_v4  ;;  %v1303_v50 = vpop.f32.mrf.mxu1 }
 0xc44   :  { %v1281_v18 = vpack.c.bf16 %v1273_v52, %v1273_v52  ;;  %v1903_v52 = vld [vmem:[%s2595_s6 + $0x10] sm:$0xff] }
 0xc49   :  { %v2041_v41 = vpop.eup %2040 }
 0xc4a   :  { %v1275_v14 = vmul.f32 %v2041_v41, %v2029_v47  ;;  %v1390_v48 = vpop.permute.xlu2 %1389 }
 0xc4b   :  { %v1395_v15 = vsel %vm490_vm9, %v1390_v48, 0 }
 0xc4c   :  { %v1283_v16 = vpack.c.bf16 %v1275_v14, %v1275_v14  ;;  %1404 = vmatpush.bf16.msra.mxu2 %v1395_v15 }
 0xc4e   :  { %1837 = vmatmul.msk.bf16.vlgmr.msrb.gmra.mxu0 %vm201_vm8, %v1283_v16 }
 0xc4f   :  { %1835 = vmatmul.msk.bf16.vlgmr.msra.gmra.mxu2 %vm201_vm8, %v1281_v18 }
 0xc83   :  { %v1343_v19 = vpop.f32.mrf.mxu3 }
 0xc8b   :  { %v1345_v20 = vpop.f32.mrf.mxu3 }
 0xc8f   :  { %v1364_v21 = vpop.f32.mrf.mxu0 }
 0xc90   :  { %v1935_v23 = vpack.i.bf16 %v1364_v21, %v1343_v19 }
 0xc92   :  { %1936 = vrot.lane.b32.xlu2 %v1935_v23, %s2086_s1 }
 0xc97   :  { %v1366_v25 = vpop.f32.mrf.mxu0 }
 0xc9f   :  { %v1427_v26 = vpop.f32.mrf.mxu3 }
 0xca0   :  { %v1385_v27 = vpop.f32.mrf.mxu1 }
 0xca7   :  { %v1429_v29 = vpop.f32.mrf.mxu3 }
 0xca8   :  { %v1387_v30 = vpop.f32.mrf.mxu1 }
 0xccb   :  { %v1448_v57 = vpop.f32.mrf.mxu0 }
 0xccc   :  { %v1945_v46 = vpack.i.bf16 %v1448_v57, %v1427_v26 }
 0xcce   :  { %1946 = vrot.lane.b32.xlu0 %v1945_v46, %s2087_s19  ;;  %v1564_v46 = vperm.slane %v2401_v11, 2 }
 0xcd2   :  { %v1406_v31 = vpop.f32.mrf.mxu2 }
 0xcd3   :  { %v1940_v32 = vpack.i.bf16 %v1406_v31, %v1385_v27  ;;  %v1450_v28 = vpop.f32.mrf.mxu0 }
 0xcd5   :  { %1941 = vrot.lane.b32.xlu1 %v1940_v32, %s2088_s2 }
 0xcda   :  { %v1408_v33 = vpop.f32.mrf.mxu2 }
 0xcdb   :  { %v1567_v33 = vperm.slane %v2401_v11, 3 }
 0xcec   :  { %v1937_v53 = vpop.permute.xlu2 %1936 }
 0xced   :  { %v1939_v36 = vunpack.i.h.bf16 %v1937_v53  ;;  %v1938_v51 = vunpack.i.l.bf16 %v1937_v53 }
 0xcef   :  { %v1477_v42 = vsel %vm201_vm8, %v1322_v35, %v1939_v36  ;;  %v1476_v7 = vsel %vm201_vm8, %v1301_v49, %v1938_v51 }
 0xd40   :  { %v1947_v47 = vpop.permute.xlu0 %1946 }
 0xd41   :  { %v1949_v6 = vunpack.i.h.bf16 %v1947_v47  ;;  %v1948_v43 = vunpack.i.l.bf16 %v1947_v47 }
 0xd47   :  { %v1942_v37 = vpop.permute.xlu1 %1941 }
 0xd48   :  { %v1944_v40 = vunpack.i.h.bf16 %v1942_v37  ;;  %v1943_v1 = vunpack.i.l.bf16 %v1942_v37  ;;  %v1908_v37 = vld [vmem:[%s2596_s7 + $0x38] sm:$0xff] }
 0xd49   :  { %1666 = vmatpush.bf16.msrb.mxu3 %v1908_v37 }
 0xd4a   :  { %v1478_v12 = vsel %vm680_vm10, %v1476_v7, %v1943_v1  ;;  %v1479_v9 = vsel %vm680_vm10, %v1477_v42, %v1944_v40  ;;  %v1907_v40 = vld [vmem:[%s2596_s7 + $0x30] sm:$0xff]  ;;  %v1906_v1 = vld [vmem:[%s2596_s7 + $0x28] sm:$0xff]  ;;  %v1905_v42 = vld [vmem:[%s2596_s7 + $0x20] sm:$0xff]  ;;  %v1576_v7 = vperm.slane %v2401_v11, 4  ;;  %s2089_s7 = smov [#allocation2]  }
 0xd4b   :  { %v1480_v44 = vsel %vm683_vm11, %v1478_v12, %v1948_v43  ;;  %v1481_v45 = vsel %vm683_vm11, %v1479_v9, %v1949_v6  ;;  %s1734_s0 = sshll.u32 %s2089_s7, 4  ;;  %s1735_s0 = int_to_ptr.vmem [resolvable:$true] %s1734_s0 }
 0xd4c   :  { %v1482_v55 = vpack.c.bf16 %v1481_v45, %v1480_v44 }
 0xd4d   :  { %1667 = vmatpush.bf16.msrb.mxu3 %v1907_v40 }
 0xd4e   :  { %1850 = vmatmul.msk.bf16.vlgmr.msrb.gmra.mxu1 %vm38_vm0, %v1482_v55 }
 0xd51   :  { %1668 = vmatpush.bf16.msrb.mxu3 %v1906_v1 }
 0xd55   :  { %1669 = vmatpush.bf16.msrb.mxu3 %v1905_v42 }
 0xdcb   :  { %v1513_v56 = vpop.f32.mrf.mxu1 }
 0xdcc   :  { %v1514_v39 = vadd.f32 %v1513_v56, %v1488_v54 }
 0xdce   :  { %v1518_v17 = vadd.f32 %v1514_v39, %v2391_v5 }
 0xdd0   :  { %v1520_v58 = vsel %vm38_vm0, %v1518_v17, 0.0 }
 0xdd1   :  { %1521 = vadd.xlane.f32.xlu2 %v1520_v58 }
 0xdd3   :  { %v1515_v24 = vpop.f32.mrf.mxu1 }
 0xdd4   :  { %v1516_v59 = vadd.f32 %v1515_v24, %v1488_v54 }
 0xdd6   :  { %v1519_v22 = vadd.f32 %v1516_v59, %v2393_v8  ;;  %v1904_v8 = vld [vmem:[%s2595_s6 + $0x18] sm:$0xff] }
 0xdd7   :  { %1598 = vmatpush.bf16.msrb.mxu2 %v1904_v8 }
 0xdd8   :  { %v1523_v61 = vsel %vm38_vm0, %v1519_v22, 0.0 }
 0xdd9   :  { %1524 = vadd.xlane.f32.xlu1 %v1523_v61 }
 0xddb   :  { %1599 = vmatpush.bf16.msrb.mxu2 %v1903_v52 }
 0xe44   :  { %v1522_v63 = vpop.xlane.xlu2 %1521 }
 0xe45   :  { %v1526_v62 = vmul.f32 %v1522_v63, %v2149_v10 }
 0xe47   :  { %v1528_v0 = vsub.f32 %v1518_v17, %v1526_v62 }
 0xe49   :  { %v1530_v2 = vmul.f32 %v1528_v0, %v1528_v0 }
 0xe4b   :  { %v1532_v35 = vsel %vm38_vm0, %v1530_v2, 0.0 }
 0xe4c   :  { %v1525_v3 = vpop.xlane.xlu1 %1524  ;;  %1533 = vadd.xlane.f32.xlu0 %v1532_v35 }
 0xe4d   :  { %v1527_v5 = vmul.f32 %v1525_v3, %v2149_v10 }
 0xe4f   :  { %v1529_v38 = vsub.f32 %v1519_v22, %v1527_v5 }
 0xe51   :  { %v1531_v49 = vmul.f32 %v1529_v38, %v1529_v38 }
 0xe53   :  { %v1535_v4 = vsel %vm38_vm0, %v1531_v49, 0.0 }
 0xe54   :  { %1536 = vadd.xlane.f32.xlu2 %v1535_v4 }
 0xebf   :  { %v1534_v50 = vpop.xlane.xlu0 %1533 }
 0xec0   :  { %v1538_v13 = vmul.f32 %v1534_v50, %v2149_v10 }
 0xec2   :  { %v1540_v41 = vadd.f32 1e-12, %v1538_v13 }
 0xec4   :  { %2042 = vrsqrt.f32 %v1540_v41  ;;  %vm1548_vm9 = vweird.f32 %v1540_v41 }
 0xec7   :  { %v1537_v14 = vpop.xlane.xlu2 %1536 }
 0xec8   :  { %v1539_v48 = vmul.f32 %v1537_v14, %v2149_v10 }
 0xeca   :  { %v2043_v15 = vpop.eup %2042  ;;  %v1541_v16 = vadd.f32 1e-12, %v1539_v48 }
 0xecb   :  { %v1543_v18 = vmul.f32 %v2043_v15, %v1540_v41  ;;  %vm1549_vm8 = vweird.f32 %v2043_v15 }
 0xecc   :  { %2044 = vrsqrt.f32 %v1541_v16  ;;  %vm1550_vm10 = vmor %vm1548_vm9, %vm1549_vm8  ;;  %vm1558_vm14 = vweird.f32 %v1541_v16 }
 0xecd   :  { %v1544_v19 = vmul.f32 %v2043_v15, %v1543_v18 }
 0xecf   :  { %v1545_v20 = vmul.f32 0.5, %v1544_v19 }
 0xed1   :  { %v1546_v21 = vsub.f32 1.5, %v1545_v20 }
 0xed2   :  { %v2045_v23 = vpop.eup %2044 }
 0xed3   :  { %v1547_v25 = vmul.f32 %v2043_v15, %v1546_v21  ;;  %v1553_v26 = vmul.f32 %v2045_v23, %v1541_v16  ;;  %vm1559_vm11 = vweird.f32 %v2045_v23 }
 0xed4   :  { %vm1560_vm15 = vmor %vm1558_vm14, %vm1559_vm11 }
 0xed5   :  { %v1554_v27 = vmul.f32 %v2045_v23, %v1553_v26  ;;  %v1551_v29 = vsel %vm1550_vm10, %v2043_v15, %v1547_v25 }
 0xed6   :  { %v1562_v31 = vmul.f32 %v1551_v29, %v1528_v0 }
 0xed7   :  { %v1555_v30 = vmul.f32 0.5, %v1554_v27 }
 0xed8   :  { %v1565_v60 = vmul.f32 %v1564_v46, %v1562_v31 }
 0xed9   :  { %v1556_v57 = vsub.f32 1.5, %v1555_v30 }
 0xeda   :  { %v1568_v36 = vadd.f32 %v1567_v33, %v1565_v60 }
 0xedb   :  { %v1557_v32 = vmul.f32 %v2045_v23, %v1556_v57 }
 0xedd   :  { %v1561_v28 = vsel %vm1560_vm15, %v2045_v23, %v1557_v32 }
 0xede   :  { %v1563_v34 = vmul.f32 %v1561_v28, %v1529_v38  ;;  %v1634_v38 = vperm.slane %v2401_v11, 5 }
 0xee0   :  { %v1566_v53 = vmul.f32 %v1564_v46, %v1563_v34 }
 0xee2   :  { %v1569_v51 = vadd.f32 %v1567_v33, %v1566_v53 }
 0xee4   :  { %v1570_v47 = vpack.c.bf16 %v1569_v51, %v1568_v36 }
 0xee6   :  { %1863 = vmatmul.msk.bf16.vlgmr.msrb.gmra.mxu2 %vm38_vm0, %v1570_v47  ;;  %v1722_v47 = vperm.slane %v2401_v11, 6 }
 0xf69   :  { %v1601_v6 = vpop.f32.mrf.mxu2 }
 0xf6a   :  { %v1602_v43 = vadd.f32 %v1601_v6, %v1576_v7 }
 0xf6c   :  { %v1608_v12 = vmul.f32 0.044715, %v1602_v43  ;;  %v1606_v62 = vmul.f32 0.5, %v1602_v43 }
 0xf6e   :  { %v1610_v9 = vmul.f32 %v1608_v12, %v1602_v43 }
 0xf70   :  { %v1612_v44 = vmul.f32 %v1610_v9, %v1602_v43 }
 0xf71   :  { %v1603_v45 = vpop.f32.mrf.mxu2 }
 0xf72   :  { %v1614_v55 = vadd.f32 %v1612_v44, %v1602_v43  ;;  %v1604_v54 = vadd.f32 %v1603_v45, %v1576_v7 }
 0xf74   :  { %v1609_v56 = vmul.f32 0.044715, %v1604_v54  ;;  %v1616_v39 = vmul.f32 0.7978846, %v1614_v55  ;;  %v1607_v0 = vmul.f32 0.5, %v1604_v54 }
 0xf76   :  { %v1611_v17 = vmul.f32 %v1609_v56, %v1604_v54  ;;  %2046 = vtanh.f32 %v1616_v39 }
 0xf78   :  { %v1613_v58 = vmul.f32 %v1611_v17, %v1604_v54 }
 0xf7a   :  { %v1615_v24 = vadd.f32 %v1613_v58, %v1604_v54 }
 0xf7c   :  { %v1617_v59 = vmul.f32 0.7978846, %v1615_v24  ;;  %v2047_v22 = vpop.eup %2046 }
 0xf7d   :  { %v1620_v61 = vadd.f32 1.0, %v2047_v22 }
 0xf7e   :  { %2048 = vtanh.f32 %v1617_v59 }
 0xf7f   :  { %v1622_v35 = vmul.f32 %v1620_v61, %v1606_v62 }
 0xf84   :  { %v2049_v63 = vpop.eup %2048 }
 0xf85   :  { %v1621_v2 = vadd.f32 1.0, %v2049_v63 }
 0xf87   :  { %v1623_v3 = vmul.f32 %v1621_v2, %v1607_v0 }
 0xf89   :  { %v1624_v5 = vpack.c.bf16 %v1623_v3, %v1622_v35 }
 0xf8b   :  { %1888 = vmatmul.msk.bf16.vlgmr.msrb.gmra.mxu3 %vm860_vm3, %v1624_v5 }
0x100e   :  { %v1671_v49 = vpop.f32.mrf.mxu3 }
0x100f   :  { %v1672_v4 = vadd.f32 %v1671_v49, %v1634_v38 }
0x1011   :  { %v1676_v8 = vadd.f32 %v1672_v4, %v1568_v36 }
0x1013   :  { %v1678_v50 = vsel %vm38_vm0, %v1676_v8, 0.0 }
0x1014   :  { %1679 = vadd.xlane.f32.xlu1 %v1678_v50 }
0x1016   :  { %v1673_v13 = vpop.f32.mrf.mxu3 }
0x1017   :  { %v1674_v41 = vadd.f32 %v1673_v13, %v1634_v38 }
0x1019   :  { %v1677_v52 = vadd.f32 %v1674_v41, %v1569_v51 }
0x101b   :  { %v1681_v14 = vsel %vm38_vm0, %v1677_v52, 0.0 }
0x101c   :  { %1682 = vadd.xlane.f32.xlu0 %v1681_v14 }
0x1087   :  { %v1680_v48 = vpop.xlane.xlu1 %1679 }
0x1088   :  { %v1684_v15 = vmul.f32 %v1680_v48, %v2149_v10 }
0x108a   :  { %v1686_v16 = vsub.f32 %v1676_v8, %v1684_v15 }
0x108c   :  { %v1688_v18 = vmul.f32 %v1686_v16, %v1686_v16 }
0x108e   :  { %v1690_v19 = vsel %vm38_vm0, %v1688_v18, 0.0 }
0x108f   :  { %v1683_v20 = vpop.xlane.xlu0 %1682  ;;  %1691 = vadd.xlane.f32.xlu2 %v1690_v19 }
0x1090   :  { %v1685_v21 = vmul.f32 %v1683_v20, %v2149_v10 }
0x1092   :  { %v1687_v23 = vsub.f32 %v1677_v52, %v1685_v21 }
0x1094   :  { %v1689_v25 = vmul.f32 %v1687_v23, %v1687_v23 }
0x1096   :  { %v1693_v26 = vsel %vm38_vm0, %v1689_v25, 0.0 }
0x1097   :  { %1694 = vadd.xlane.f32.xlu1 %v1693_v26 }
0x1102   :  { %v1692_v27 = vpop.xlane.xlu2 %1691 }
0x1103   :  { %v1696_v29 = vmul.f32 %v1692_v27, %v2149_v10 }
0x1105   :  { %v1698_v30 = vadd.f32 1e-12, %v1696_v29 }
0x1107   :  { %2050 = vrsqrt.f32 %v1698_v30  ;;  %vm1706_vm2 = vweird.f32 %v1698_v30 }
0x110a   :  { %v1695_v57 = vpop.xlane.xlu1 %1694 }
0x110b   :  { %v1697_v46 = vmul.f32 %v1695_v57, %v2149_v10  ;;  %v1725_v10 = vperm.slane %v2401_v11, 7 }
0x110d   :  { %v2051_v31 = vpop.eup %2050  ;;  %v1699_v32 = vadd.f32 1e-12, %v1697_v46 }
0x110e   :  { %v1701_v28 = vmul.f32 %v2051_v31, %v1698_v30  ;;  %vm1707_vm1 = vweird.f32 %v2051_v31 }
0x110f   :  { %2052 = vrsqrt.f32 %v1699_v32  ;;  %vm1708_vm3 = vmor %vm1706_vm2, %vm1707_vm1  ;;  %vm1716_vm5 = vweird.f32 %v1699_v32 }
0x1110   :  { %v1702_v33 = vmul.f32 %v2051_v31, %v1701_v28 }
0x1112   :  { %v1703_v60 = vmul.f32 0.5, %v1702_v33 }
0x1114   :  { %v1704_v34 = vsub.f32 1.5, %v1703_v60 }
0x1115   :  { %v2053_v53 = vpop.eup %2052 }
0x1116   :  { %v1705_v36 = vmul.f32 %v2051_v31, %v1704_v34  ;;  %v1711_v51 = vmul.f32 %v2053_v53, %v1699_v32  ;;  %vm1717_vm4 = vweird.f32 %v2053_v53 }
0x1117   :  { %vm1718_vm6 = vmor %vm1716_vm5, %vm1717_vm4 }
0x1118   :  { %v1709_v37 = vsel %vm1708_vm3, %v2051_v31, %v1705_v36  ;;  %v1712_v40 = vmul.f32 %v2053_v53, %v1711_v51 }
0x1119   :  { %v1720_v1 = vmul.f32 %v1709_v37, %v1686_v16 }
0x111a   :  { %v1713_v42 = vmul.f32 0.5, %v1712_v40 }
0x111b   :  { %v1723_v7 = vmul.f32 %v1722_v47, %v1720_v1 }
0x111c   :  { %v1714_v6 = vsub.f32 1.5, %v1713_v42 }
0x111d   :  { %v1726_v43 = vadd.f32 %v1725_v10, %v1723_v7 }
0x111e   :  { %v1715_v12 = vmul.f32 %v2053_v53, %v1714_v6 }
0x111f   :  { %1728 = vst.msk [vmem:[#allocation2] sm:$0xff] %vm38_vm0, %v1726_v43 }
0x1120   :  { %v1719_v9 = vsel %vm1718_vm6, %v2053_v53, %v1715_v12 }
0x1121   :  { %v1721_v44 = vmul.f32 %v1719_v9, %v1687_v23 }
0x1123   :  { %v1724_v45 = vmul.f32 %v1722_v47, %v1721_v44 }
0x1125   :  { %v1727_v11 = vadd.f32 %v1725_v10, %v1724_v45 }
0x1127   :  { %1729 = vst.msk [vmem:[#allocation2 + $0x8] sm:$0xff] %vm38_vm0, %v1727_v11 }
0x1128   :  { %1742 = dma.vmem_to_hbm [thread:$0]  %s1735_s0, 256, %s1737_s15, [#allocation3], %s2090_s16, %s2090_s16, %s2086_s1  }
0x1129   :  { %2078 = dma.done.wait [#allocation3], 256  }
0x112a   :  { %2079 = vsyncadd [#allocation3], 4294967040 }
0x112b   :  { %1747 = vsyncpa [#allocation3], 1 }

</bundles_post_ra>
